<compile_context>
chip_gen: v6e
topology: v6e:2x2x1
jax: 0.10.0
libtpu: 0.0.40
codegen_flags: <defaults>
</compile_context>

<pallas_src>
import functools

import jax
import jax.numpy as jnp
from jax.experimental import pallas as pl
from jax.experimental.pallas import tpu as pltpu

# ----------------------------- module configuration --------------------------
CHAR_VOCAB_SIZE = 32     # V
CHAR_EMB_DIM    = 16     # C
NUM_FILTERS     = 8      # F
KERNEL_LST      = (3, 5)
MAX_WORD_LEN    = 16     # w
BEFORE_ATT_SIZE = 32     # A
HIDDEN          = 128    # fixed 128 in the module
B, S = 2, 8              # batch, sentence length

V, C, F, A, W = CHAR_VOCAB_SIZE, CHAR_EMB_DIM, NUM_FILTERS, BEFORE_ATT_SIZE, MAX_WORD_LEN
F_TOT      = F * len(KERNEL_LST)                  # 16 conv channels (both branches)
T_TAPS     = sum(KERNEL_LST)                      # 8 taps total
N_QUADS    = (T_TAPS + 3) // 4                    # 2 quads of 4 taps
T_PAD      = 4 * N_QUADS                          # 8 (taps padded to full quads)
QUAD_LANES = 4 * V                                # 128 lanes per quad one-hot
KDIM       = T_PAD * V                            # 256 fused (tap, char-id) contraction
P_PAD      = ((W + 7) // 8) * 8                   # 16 pool positions, tile aligned
TAP_OFF    = tuple(t - k // 2 for k in KERNEL_LST for t in range(k))  # char offset per tap

# packed-parameter slab layout (all row offsets multiples of 8)
ROW_BCONV = 0                                     # 1 row  : conv biases        [:F_TOT]
ROW_PMASK = 8                                     # P_PAD  : additive pool mask [:F_TOT]
ROW_W1    = ROW_PMASK + P_PAD                     # 24     : (F_TOT, 128)
ROW_B1    = ROW_W1 + ((F_TOT + 7) // 8) * 8       # 40     : 1 row
ROW_W2    = ROW_B1 + 8                            # 48     : (128, 128)
ROW_B2    = ROW_W2 + HIDDEN                       # 176    : 1 row
MLP_ROWS  = ROW_B2 + 8                            # 184

TILE_N_MAX = 256                                  # words per grid step at realistic sizes
VMEM_LIMIT = 48 * 1024 * 1024                     # explicit scoped-VMEM budget (all gens)


# ------------------------------- Pallas kernel -------------------------------
def cnn_char_kernel(ids_ref, wconv_ref, wmlp_ref, out_ref, *, tile_n):
    rows = tile_n * P_PAD
    ids = ids_ref[...]                                           # (rows, T_PAD) int32

    # ---- one-hot + embedding + both Conv1d branches (quad-grouped) ----------
    # Each quad packs 4 taps into one 128-lane compare block (ids were biased
    # by (tap % 4) * V in the wrapper; match ranges are disjoint so OR == sum).
    # Sentinel -1 never matches the 0..127 iota => exact zero conv padding.
    col = jax.lax.broadcasted_iota(jnp.int32, (rows, QUAD_LANES), 1)
    conv = None
    for g in range(N_QUADS):
        m = col == ids[:, 4 * g:4 * g + 1]
        for j in range(1, 4):
            m = m | (col == ids[:, 4 * g + j:4 * g + j + 1])
        oh = jnp.where(m, 1.0, 0.0)                              # exact 0/1 f32
        part = jnp.dot(oh, wconv_ref[QUAD_LANES * g:QUAD_LANES * (g + 1), :],
                       preferred_element_type=jnp.float32)       # (rows, F_TOT)
        conv = part if conv is None else conv + part

    conv = conv + wmlp_ref[ROW_BCONV:ROW_BCONV + 1, 0:F_TOT]
    act = jnp.tanh(conv).reshape(tile_n, P_PAD, F_TOT)           # tile-aligned (free)

    # ---- MaxPool1d(w-k+1) per branch ----------------------------------------
    # Static validity mask precomputed in the slab (0 for valid positions,
    # -1e30 for positions outside the branch's single pool window), added
    # AFTER tanh so masked positions can never win the max.
    pmask = wmlp_ref[ROW_PMASK:ROW_PMASK + P_PAD, 0:F_TOT]       # (P_PAD, F_TOT)
    h = jnp.max(act + pmask[None], axis=1)                       # (tile_n, F_TOT)

    # ---- MLP head: Linear(16->128) -> ReLU -> Linear(128->A, padded to 128) --
    w1 = wmlp_ref[ROW_W1:ROW_W1 + F_TOT, :]
    b1 = wmlp_ref[ROW_B1:ROW_B1 + 1, :]
    w2 = wmlp_ref[ROW_W2:ROW_W2 + HIDDEN, :]
    b2 = wmlp_ref[ROW_B2:ROW_B2 + 1, :]
    h1 = jnp.maximum(jnp.dot(h, w1, preferred_element_type=jnp.float32) + b1, 0.0)
    out = jnp.dot(h1, w2, preferred_element_type=jnp.float32) + b2
    out_ref[...] = out.astype(out_ref.dtype)                     # lane-dense (tile_n, 128)


# ------------------------------- wrapper (glue) -------------------------------
def _round_up(a, m):
    return ((a + m - 1) // m) * m


def _choose_tile_n(n):
    # Raise the row tile well above 8 at realistic sizes, but keep >= 2 grid
    # steps when possible so ("parallel",) can shard rows across v7x's two
    # TensorCores.  TILE_N_MAX=256 keeps per-step VMEM (~16 MiB) inside the
    # explicit 48 MiB limit on v5e / v6e / v7x alike.
    n8 = _round_up(max(n, 1), 8)
    tile_n = min(TILE_N_MAX, n8)
    if n8 // tile_n < 2 and tile_n > 8:
        tile_n = max(8, _round_up(tile_n // 2, 8))
    return tile_n


def cnn_char_forward(x, params):
    b, s, w = x.shape
    assert w == W and HIDDEN == 128 and A <= 128
    n = b * s
    tile_n = _choose_tile_n(n)
    n_pad = _round_up(n, tile_n)

    # ---- fold embedding into per-tap conv weights: (KDIM, F_TOT) ----
    blocks = []
    for bi, k in enumerate(KERNEL_LST):
        wk = params[f"conv{k}_w"]                                # (F, C, k)
        for tau in range(k):
            blk = (jnp.zeros((C, F_TOT), jnp.float32)
                   .at[:, bi * F:(bi + 1) * F].set(wk[:, :, tau].T))
            blocks.append(params["embed"] @ blk)                 # (V, F_TOT)
    w_conv = jnp.concatenate(blocks, axis=0)                     # (T_TAPS*V, F_TOT)
    if w_conv.shape[0] != KDIM:                                  # pad to full quads
        w_conv = jnp.concatenate(
            [w_conv, jnp.zeros((KDIM - w_conv.shape[0], F_TOT), jnp.float32)], axis=0)

    # ---- pack remaining small params + static pool mask into one slab ----
    bconv = jnp.concatenate([params[f"conv{k}_b"] for k in KERNEL_LST])      # (F_TOT,)
    limits = jnp.concatenate(
        [jnp.full((F,), W - k + 1, jnp.int32) for k in KERNEL_LST])          # (F_TOT,)
    pmask = jnp.where(
        jnp.arange(P_PAD, dtype=jnp.int32)[:, None] < limits[None, :],
        0.0, -1e30).astype(jnp.float32)                                      # (P_PAD, F_TOT)
    w2p = jnp.zeros((HIDDEN, 128), jnp.float32).at[:, :A].set(params["w2"])
    b2p = jnp.zeros((128,), jnp.float32).at[:A].set(params["b2"])
    slab = jnp.zeros((MLP_ROWS, 128), jnp.float32)
    slab = slab.at[ROW_BCONV, :F_TOT].set(bconv)
    slab = slab.at[ROW_PMASK:ROW_PMASK + P_PAD, :F_TOT].set(pmask)
    slab = slab.at[ROW_W1:ROW_W1 + F_TOT, :].set(params["w1"])
    slab = slab.at[ROW_B1, :].set(params["b1"])
    slab = slab.at[ROW_W2:ROW_W2 + HIDDEN, :].set(w2p)
    slab = slab.at[ROW_B2, :].set(b2p)

    # ---- windowed char ids, biased by (tap % 4) * V for the quad one-hot ----
    # (per-row orientation kept so the kernel-side ids[:, j:j+1] column
    #  broadcast needs no lane->sublane relayout; sentinel -1 == zero padding)
    xf = x.reshape(n, w).astype(jnp.int32)
    offs = jnp.asarray(TAP_OFF, jnp.int32)                                   # (T,)
    pos = jnp.arange(P_PAD, dtype=jnp.int32)[:, None] + offs[None, :]        # (P_PAD, T)
    valid = (pos >= 0) & (pos < w)
    gath = xf[:, jnp.clip(pos, 0, w - 1)]                                    # (n, P_PAD, T)
    quad_bias = ((jnp.arange(T_TAPS, dtype=jnp.int32) % 4) * V)[None, None, :]
    ids = jnp.where(valid[None], gath + quad_bias, -1)
    if T_PAD != T_TAPS:
        ids = jnp.pad(ids, ((0, 0), (0, 0), (0, T_PAD - T_TAPS)),
                      constant_values=-1)
    if n_pad != n:
        ids = jnp.concatenate(
            [ids, jnp.full((n_pad - n, P_PAD, T_PAD), -1, jnp.int32)], axis=0)
    ids = ids.reshape(n_pad * P_PAD, T_PAD).astype(jnp.int32)

    out = pl.pallas_call(
        functools.partial(cnn_char_kernel, tile_n=tile_n),
        out_shape=jax.ShapeDtypeStruct((n_pad, 128), jnp.float32),
        grid=(n_pad // tile_n,),
        in_specs=[
            pl.BlockSpec((tile_n * P_PAD, T_PAD), lambda i: (i, 0)),   # ids (per step)
            pl.BlockSpec((KDIM, F_TOT), lambda i: (0, 0)),             # fused conv wt
            pl.BlockSpec((MLP_ROWS, 128), lambda i: (0, 0)),           # packed params
        ],
        out_specs=pl.BlockSpec((tile_n, 128), lambda i: (i, 0)),
        compiler_params=pltpu.CompilerParams(
            dimension_semantics=("parallel",),
            vmem_limit_bytes=VMEM_LIMIT),
    )(ids, w_conv, slab)
    return out[:n, :A].reshape(b, s, A)


# ------------------------------ pure-JAX reference ----------------------------
def reference(x, params):
    b, s, w = x.shape
    emb = params["embed"][x].reshape(b * s, w, C)
    xcw = jnp.transpose(emb, (0, 2, 1))                          # NCW like torch
    feats = []
    for k in KERNEL_LST:
        pad = k // 2
        conv = jax.lax.conv_general_dilated(
            xcw, params[f"conv{k}_w"], (1,), [(pad, pad)],
            dimension_numbers=("NCH", "OIH", "NCH"))
        conv = conv + params[f"conv{k}_b"][None, :, None]
        act = jnp.tanh(conv)
        # MaxPool1d(w-k+1), stride=w-k+1: single window over the first w-k+1 cols
        feats.append(jnp.max(act[:, :, : w - k + 1], axis=-1))
    h = jnp.concatenate(feats, axis=-1)
    h1 = jnp.maximum(h @ params["w1"] + params["b1"], 0.0)
    return (h1 @ params["w2"] + params["b2"]).reshape(b, s, A)


# ---------------------------------- main --------------------------------------
def init_params(key):
    ks = jax.random.split(key, 10)
    p = {}
    # nn.init.uniform_(embed.weight, -0.25, 0.25) (overwrites padding row too)
    p["embed"] = jax.random.uniform(ks[0], (CHAR_VOCAB_SIZE, C),
                                    minval=-0.25, maxval=0.25, dtype=jnp.float32)
    for i, k in enumerate(KERNEL_LST):
        p[f"conv{k}_w"] = jax.random.uniform(ks[1 + 2 * i], (F, C, k),
                                             minval=-0.1, maxval=0.1,
                                             dtype=jnp.float32)
        p[f"conv{k}_b"] = jax.random.uniform(ks[2 + 2 * i], (F,),
                                             minval=-0.1, maxval=0.1,
                                             dtype=jnp.float32)
    fin = F * len(KERNEL_LST)
    p["w1"] = jax.random.uniform(ks[6], (fin, HIDDEN), minval=-0.1, maxval=0.1,
                                 dtype=jnp.float32)
    p["b1"] = jax.random.uniform(ks[7], (HIDDEN,), minval=-0.1, maxval=0.1,
                                 dtype=jnp.float32)
    p["w2"] = jax.random.uniform(ks[8], (HIDDEN, A), minval=-0.1, maxval=0.1,
                                 dtype=jnp.float32)
    p["b2"] = jax.random.uniform(ks[9], (A,), minval=-0.1, maxval=0.1,
                                 dtype=jnp.float32)
    return p


if __name__ == "__main__":
    key = jax.random.PRNGKey(0)
    kx, kp = jax.random.split(key)
    x = jax.random.randint(kx, (B, S, MAX_WORD_LEN), 0, CHAR_VOCAB_SIZE,
                           dtype=jnp.int32)
    # y is an argument of CNN_char.forward but is never used in the body.
    params = init_params(kp)

    out = cnn_char_forward(x, params)
    out = jax.block_until_ready(out)
    assert out.shape == (B, S, BEFORE_ATT_SIZE), out.shape

    ref = jax.block_until_ready(reference(x, params))
    assert jnp.allclose(out, ref, atol=1e-4, rtol=1e-4), (
        float(jnp.max(jnp.abs(out - ref))))

    print("KERNEL_OK")
</pallas_src>

<mosaic_0001>
module attributes {stable_mosaic.version = 11 : i64} {
  func.func @cnn_char_kernel(%arg0: i32, %arg1: memref<128x8xi32, #tpu.memory_space<vmem>>, %arg2: memref<256x16xf32, #tpu.memory_space<vmem>>, %arg3: memref<184x128xf32, #tpu.memory_space<vmem>>, %arg4: memref<8x128xf32, #tpu.memory_space<vmem>>) attributes {dimension_semantics = [#tpu.dimension_semantics<parallel>], iteration_bounds = array<i64: 2>, scalar_prefetch = 0 : i64, scratch_operands = 0 : i64, tpu.core_type = #tpu.core_type<tc>, window_params = [{transform_indices = @transform_0, window_bounds = array<i64: 128, 8>}, {pipeline_mode = #tpu.pipeline_mode<synchronous>, transform_indices = @transform_1, window_bounds = array<i64: 256, 16>}, {pipeline_mode = #tpu.pipeline_mode<synchronous>, transform_indices = @transform_2, window_bounds = array<i64: 184, 128>}, {transform_indices = @transform_3, window_bounds = array<i64: 8, 128>}]} {
    %c0 = arith.constant 0 : index
    %c0_0 = arith.constant 0 : index
    %0 = vector.load %arg1[%c0, %c0_0] : memref<128x8xi32, #tpu.memory_space<vmem>>, vector<128x8xi32>
    %1 = tpu.iota {dimensions = array<i32: 1>} : vector<128x128xi32>
    %2 = vector.extract_strided_slice %0 {offsets = [0, 0], sizes = [128, 1], strides = [1, 1]} : vector<128x8xi32> to vector<128x1xi32>
    %3 = vector.broadcast %2 : vector<128x1xi32> to vector<128x128xi32>
    %4 = arith.cmpi eq, %1, %3 : vector<128x128xi32>
    %5 = vector.extract_strided_slice %0 {offsets = [0, 1], sizes = [128, 1], strides = [1, 1]} : vector<128x8xi32> to vector<128x1xi32>
    %6 = vector.broadcast %5 : vector<128x1xi32> to vector<128x128xi32>
    %7 = arith.cmpi eq, %1, %6 : vector<128x128xi32>
    %8 = arith.ori %4, %7 : vector<128x128xi1>
    %9 = vector.extract_strided_slice %0 {offsets = [0, 2], sizes = [128, 1], strides = [1, 1]} : vector<128x8xi32> to vector<128x1xi32>
    %10 = vector.broadcast %9 : vector<128x1xi32> to vector<128x128xi32>
    %11 = arith.cmpi eq, %1, %10 : vector<128x128xi32>
    %12 = arith.ori %8, %11 : vector<128x128xi1>
    %13 = vector.extract_strided_slice %0 {offsets = [0, 3], sizes = [128, 1], strides = [1, 1]} : vector<128x8xi32> to vector<128x1xi32>
    %14 = vector.broadcast %13 : vector<128x1xi32> to vector<128x128xi32>
    %15 = arith.cmpi eq, %1, %14 : vector<128x128xi32>
    %16 = arith.ori %12, %15 : vector<128x128xi1>
    %cst = arith.constant 1.000000e+00 : f32
    %cst_1 = arith.constant 0.000000e+00 : f32
    %17 = vector.broadcast %cst : f32 to vector<128x128xf32>
    %18 = vector.broadcast %cst_1 : f32 to vector<128x128xf32>
    %19 = arith.select %16, %17, %18 : vector<128x128xi1>, vector<128x128xf32>
    %c0_2 = arith.constant 0 : index
    %c0_3 = arith.constant 0 : index
    %20 = vector.load %arg2[%c0_2, %c0_3] : memref<256x16xf32, #tpu.memory_space<vmem>>, vector<128x16xf32>
    %cst_4 = arith.constant dense<0.000000e+00> : vector<128x16xf32>
    %21 = tpu.matmul %19, %20, %cst_4 {dimension_numbers = #tpu.dot_dimension_numbers<[1], [0], [0], [1], [0, 0, 1, 1], [], []>} : vector<128x128xf32>, vector<128x16xf32>, vector<128x16xf32> -> vector<128x16xf32>
    %22 = vector.extract_strided_slice %0 {offsets = [0, 4], sizes = [128, 1], strides = [1, 1]} : vector<128x8xi32> to vector<128x1xi32>
    %23 = vector.broadcast %22 : vector<128x1xi32> to vector<128x128xi32>
    %24 = arith.cmpi eq, %1, %23 : vector<128x128xi32>
    %25 = vector.extract_strided_slice %0 {offsets = [0, 5], sizes = [128, 1], strides = [1, 1]} : vector<128x8xi32> to vector<128x1xi32>
    %26 = vector.broadcast %25 : vector<128x1xi32> to vector<128x128xi32>
    %27 = arith.cmpi eq, %1, %26 : vector<128x128xi32>
    %28 = arith.ori %24, %27 : vector<128x128xi1>
    %29 = vector.extract_strided_slice %0 {offsets = [0, 6], sizes = [128, 1], strides = [1, 1]} : vector<128x8xi32> to vector<128x1xi32>
    %30 = vector.broadcast %29 : vector<128x1xi32> to vector<128x128xi32>
    %31 = arith.cmpi eq, %1, %30 : vector<128x128xi32>
    %32 = arith.ori %28, %31 : vector<128x128xi1>
    %33 = vector.extract_strided_slice %0 {offsets = [0, 7], sizes = [128, 1], strides = [1, 1]} : vector<128x8xi32> to vector<128x1xi32>
    %34 = vector.broadcast %33 : vector<128x1xi32> to vector<128x128xi32>
    %35 = arith.cmpi eq, %1, %34 : vector<128x128xi32>
    %36 = arith.ori %32, %35 : vector<128x128xi1>
    %cst_5 = arith.constant 1.000000e+00 : f32
    %cst_6 = arith.constant 0.000000e+00 : f32
    %37 = vector.broadcast %cst_5 : f32 to vector<128x128xf32>
    %38 = vector.broadcast %cst_6 : f32 to vector<128x128xf32>
    %39 = arith.select %36, %37, %38 : vector<128x128xi1>, vector<128x128xf32>
    %c128 = arith.constant 128 : index
    %c0_7 = arith.constant 0 : index
    %40 = vector.load %arg2[%c128, %c0_7] : memref<256x16xf32, #tpu.memory_space<vmem>>, vector<128x16xf32>
    %cst_8 = arith.constant dense<0.000000e+00> : vector<128x16xf32>
    %41 = tpu.matmul %39, %40, %cst_8 {dimension_numbers = #tpu.dot_dimension_numbers<[1], [0], [0], [1], [0, 0, 1, 1], [], []>} : vector<128x128xf32>, vector<128x16xf32>, vector<128x16xf32> -> vector<128x16xf32>
    %42 = arith.addf %21, %41 : vector<128x16xf32>
    %c0_9 = arith.constant 0 : index
    %c0_10 = arith.constant 0 : index
    %43 = vector.load %arg3[%c0_9, %c0_10] : memref<184x128xf32, #tpu.memory_space<vmem>>, vector<1x16xf32>
    %44 = vector.broadcast %43 : vector<1x16xf32> to vector<128x16xf32>
    %45 = arith.addf %42, %44 : vector<128x16xf32>
    %46 = math.tanh %45 : vector<128x16xf32>
    %47 = vector.shape_cast %46 : vector<128x16xf32> to vector<8x16x16xf32>
    %c8 = arith.constant 8 : index
    %c0_11 = arith.constant 0 : index
    %48 = vector.load %arg3[%c8, %c0_11] : memref<184x128xf32, #tpu.memory_space<vmem>>, vector<16x16xf32>
    %49 = vector.shape_cast %48 : vector<16x16xf32> to vector<1x16x16xf32>
    %50 = vector.broadcast %49 : vector<1x16x16xf32> to vector<8x16x16xf32>
    %51 = arith.addf %47, %50 : vector<8x16x16xf32>
    %cst_12 = arith.constant dense<0xFF800000> : vector<8x16xf32>
    %52 = vector.multi_reduction <maximumf>, %51, %cst_12 [1] : vector<8x16x16xf32> to vector<8x16xf32>
    %c24 = arith.constant 24 : index
    %c0_13 = arith.constant 0 : index
    %53 = vector.load %arg3[%c24, %c0_13] : memref<184x128xf32, #tpu.memory_space<vmem>>, vector<16x128xf32>
    %c40 = arith.constant 40 : index
    %c0_14 = arith.constant 0 : index
    %54 = vector.load %arg3[%c40, %c0_14] : memref<184x128xf32, #tpu.memory_space<vmem>>, vector<1x128xf32>
    %c48 = arith.constant 48 : index
    %c0_15 = arith.constant 0 : index
    %55 = vector.load %arg3[%c48, %c0_15] : memref<184x128xf32, #tpu.memory_space<vmem>>, vector<128x128xf32>
    %c176 = arith.constant 176 : index
    %c0_16 = arith.constant 0 : index
    %56 = vector.load %arg3[%c176, %c0_16] : memref<184x128xf32, #tpu.memory_space<vmem>>, vector<1x128xf32>
    %cst_17 = arith.constant dense<0.000000e+00> : vector<8x128xf32>
    %57 = tpu.matmul %52, %53, %cst_17 {dimension_numbers = #tpu.dot_dimension_numbers<[1], [0], [0], [1], [0, 0, 1, 1], [], []>} : vector<8x16xf32>, vector<16x128xf32>, vector<8x128xf32> -> vector<8x128xf32>
    %58 = vector.broadcast %54 : vector<1x128xf32> to vector<8x128xf32>
    %59 = arith.addf %57, %58 : vector<8x128xf32>
    %cst_18 = arith.constant 0.000000e+00 : f32
    %60 = vector.broadcast %cst_18 : f32 to vector<8x128xf32>
    %61 = arith.maximumf %59, %60 : vector<8x128xf32>
    %cst_19 = arith.constant dense<0.000000e+00> : vector<8x128xf32>
    %62 = tpu.matmul %61, %55, %cst_19 {dimension_numbers = #tpu.dot_dimension_numbers<[1], [0], [0], [1], [0, 0, 1, 1], [], []>} : vector<8x128xf32>, vector<128x128xf32>, vector<8x128xf32> -> vector<8x128xf32>
    %63 = vector.broadcast %56 : vector<1x128xf32> to vector<8x128xf32>
    %64 = arith.addf %62, %63 : vector<8x128xf32>
    %c0_20 = arith.constant 0 : index
    %c0_21 = arith.constant 0 : index
    %65 = vector.load %arg4[%c0_20, %c0_21] : memref<8x128xf32, #tpu.memory_space<vmem>>, vector<8x128xf32>
    tpu.vector_store %arg4[%c0_20, %c0_21], %64 {strides = array<i32>} : memref<8x128xf32, #tpu.memory_space<vmem>>, vector<8x128xf32>,
    return
  }
  func.func @transform_0(%arg0: i32) -> (i32, i32) {
    %c0_i32 = arith.constant 0 : i32
    %c0_i32_0 = arith.constant 0 : i32
    return %arg0, %c0_i32 : i32, i32
  }
  func.func @transform_1(%arg0: i32) -> (i32, i32) {
    %c0_i32 = arith.constant 0 : i32
    %c0_i32_0 = arith.constant 0 : i32
    %c0_i32_1 = arith.constant 0 : i32
    return %c0_i32, %c0_i32_0 : i32, i32
  }
  func.func @transform_2(%arg0: i32) -> (i32, i32) {
    %c0_i32 = arith.constant 0 : i32
    %c0_i32_0 = arith.constant 0 : i32
    %c0_i32_1 = arith.constant 0 : i32
    return %c0_i32, %c0_i32_0 : i32, i32
  }
  func.func @transform_3(%arg0: i32) -> (i32, i32) {
    %c0_i32 = arith.constant 0 : i32
    %c0_i32_0 = arith.constant 0 : i32
    return %arg0, %c0_i32 : i32, i32
  }
}

</mosaic_0001>

<bundles_post_ra>
// kernel: tpu_custom_call.1
= control target key start
LH: loop header
LB: loop body
LE: loop exit
PB: predicated region body
PF: predicated region fallthrough
CT: control target
= control target key end

     0   :  { %8 = vsyncpa [#allocation3], 0  ;;  %s3025_s0 = inlined_call_operand.vmem [shape: s32[256,8], index: 0, kind: input, shape index: {}]   ;;  %s3026_s1 = inlined_call_operand.vmem [shape: f32[256,16], index: 1, kind: input, shape index: {}]   ;;  %s3027_s2 = inlined_call_operand.vmem [shape: f32[184,128], index: 2, kind: input, shape index: {}]   ;;  %s3028_s3 = inlined_call_operand.hbm [shape: f32[16,128], index: 3, kind: output, shape index: {}]  }
   0x1   :  { %10 = vsyncpa [#allocation3 + $0x1], 0  ;;  %s2096_s12 = smov 0   ;;  %s2098_s13 = smov 0  }
   0x2   :  { %s2100_s14 = smov 0   ;;  %s2102_s15 = smov 0  }
   0x3 LB: > { %s2117_s16 = sadd.s32 4294967295, %s2062_s15   ;;  %s1546_s17 = sadd.s32 4294967294, %s2062_s15   ;;  %s2062_s15 = sphi %s2102_s15, %s3046_s15   ;;  %s2058_s14 = sphi %s2100_s14, %s3045_s14   ;;  %s2054_s13 = sphi %s2098_s13, %s3044_s13   ;;  %s2050_s12 = sphi %s2096_s12, %s3043_s12  }
   0x4   : > { %s2121_s18 = sadd.s32 1, %s2062_s15   ;;  %s91_s19 = sadd.s32 1, %s2058_s14 }
   0x5   : > { %s88_s20 = ssub.s32 %s2062_s15, %s2121_s18  ;;  %p101_p0 = scmp.ne.s32.totalorder %s2058_s14, %s2054_s13 }
   0x6   : > { %p89_p1 = scmp.eq.s32.totalorder %s88_s20, 0  ;;  %p102_p2 = scmp.eq.s32.totalorder %s2117_s16, 1 }
   0x7   : > { %p107_p3 = scmp.ne.s32.totalorder %s2054_s13, %s2050_s12  ;;  %p108_p4 = scmp.eq.s32.totalorder %s1546_s17, 1 }
   0x8   : > { %s2132_s21 = scalar_select %p89_p1, %s2058_s14, %s91_s19  }
   0x9   : > { %p2134_p5 = por %p102_p2, %p101_p0  ;;  %p2138_p6 = por %p108_p4, %p107_p3 }
   0xa   : > { %p1549_p7 = scmp.ge.s32.totalorder %s2062_s15, 1  ;;  %p141_p8 = scmp.lt.s32.totalorder %s2062_s15, 3 }
   0xc   : > { %p142_p9 = pnand %p1549_p7, %p141_p8 }
   0xd   : > { %s1551_s24 = sshll.u32 (!%p142_p9), %s2117_s16, 4  ;;  %s162_s5 = sand.u32 (!%p142_p9), 1, %s2054_s13  }
   0xe   : > { %145 = sbr.rel (%p142_p9) target bundleno = 1191 (0x4a7), region = 32  ;;  %p166_p10 = scmp.lt.s32.totalorder (!%p142_p9), %s1551_s24, 31 }
   0xf   : > { %s1550_s6 = sshll.u32 (!%p142_p9), %s162_s5, 3  ;;  %s1590_s9 = sshll.u32 (!%p142_p9), %s2117_s16, 7 }
  0x10   : > { %s164_s10 = scalar_lea.vmem (!%p142_p9), [#allocation2], %s1550_s6  ;;  %s2990_s20 = scalar_lea.hbm (!%p142_p9), %s3028_s3, %s1590_s9 }
  0x11   : > { %s1487_s11 = sshll.u32 (!%p142_p9), %s164_s10, 4  ;;  %s1488_s11 = int_to_ptr.vmem [resolvable:$true] %s1487_s11 }
  0x13   : > { %v2064_v0 = vmov 4   ;;  %v2065_v1 = vmov 3   ;;  %s3048_s24 = smov (!%p166_p10, %s1551_s24), 31  ;;  %v2066_v5 = vmov 5   ;;  %v2067_v8 = vmov 0   ;;  %v860_v11 = vld [vmem:[%s3026_s1 + $0xf8] sm:$0xff] }
  0x14   : > { %1881 = vset.pattern.permute.xlu1 %v2064_v0  ;;  %1900 = vset.pattern.permute.xlu0 %v2065_v1  ;;  %s1552_s25 = sshll.u32 %s3048_s24, 3  ;;  %v2068_v9 = vmov 1   ;;  %v2069_v10 = vmov 2   ;;  %v859_v13 = vld [vmem:[%s3026_s1 + $0xf0] sm:$0xff]  ;;  %v858_v14 = vld [vmem:[%s3026_s1 + $0xe8] sm:$0xff]  ;;  %v857_v16 = vld [vmem:[%s3026_s1 + $0xe0] sm:$0xff] }
  0x15   : > { %s2150_s28 = scalar_lea.vmem %s3025_s0, %s1552_s25  ;;  %1677 = vmatprep.subr.mxu0 %v860_v11  ;;  %v2070_v17 = vmov 6   ;;  %v856_v18 = vld [vmem:[%s3026_s1 + $0xd8] sm:$0xff]  ;;  %v855_v20 = vld [vmem:[%s3026_s1 + $0xd0] sm:$0xff]  ;;  %v854_v21 = vld [vmem:[%s3026_s1 + $0xc8] sm:$0xff]  ;;  %v2071_v31 = vmov 7   ;;  %s2002_s24 = scalar_lea.vmem %s1488_s11, 128 }
  0x16   : > { %v2153_v2 = vld [vmem:[%s2150_s28 + $0x18] sm:$0xff]  ;;  %v2156_v3 = vld [vmem:[%s2150_s28] sm:$0xff]  ;;  %v2170_v7 = vld [vmem:[%s2150_s28 + $0x8] sm:$0xff]  ;;  %1678 = vmatpush3.msra.mxu0 %v860_v11  ;;  %p2003_p11 = scmp.ne.s32.totalorder %s1488_s11, %s2002_s24  ;;  %s2075_s25 = smov [#allocation2]  }
  0x17   : > { %423 = vperm.xlu0 %1900, %v2153_v2   ;;  %526 = vperm.xlu1 %1881, %v2156_v3   ;;  %v2161_v4 = vld [vmem:[%s2150_s28 + $0x38] sm:$0xff]  ;;  %v2184_v12 = vld [vmem:[%s2150_s28 + $0x20] sm:$0xff]  ;;  %v2230_v24 = vld [vmem:[%s2150_s28 + $0x28] sm:$0xff]  ;;  %s2006_s16 = sshll.u32 %s2075_s25, 4  ;;  %s2007_s16 = int_to_ptr.vmem [resolvable:$false] %s2006_s16 }
  0x18   : > { %v2167_v6 = vld [vmem:[%s2150_s28 + $0x58] sm:$0xff]  ;;  %1679 = vmatprep.subr.mxu0 %v859_v13  ;;  %v2196_v15 = vld [vmem:[%s2150_s28 + $0x40] sm:$0xff]  ;;  %v851_v25 = vld [vmem:[%s3026_s1 + $0xb0] sm:$0xff]  ;;  %p2004_p12 = pnand %p2003_p11, %p2134_p5  ;;  %s2008_s26 = scalar_lea.vmem %s2007_s16, 256 }
  0x19   : > { %1680 = vmatpush3.msra.mxu0 %v859_v13  ;;  %v2208_v19 = vld [vmem:[%s2150_s28 + $0x60] sm:$0xff]  ;;  %v852_v23 = vld [vmem:[%s3026_s1 + $0xb8] sm:$0xff]  ;;  %v850_v26 = vld [vmem:[%s3026_s1 + $0xa8] sm:$0xff]  ;;  %p2009_p0 = scmp.lt.s32.totalorder %s1488_s11, %s2007_s16  ;;  %p2010_p1 = scmp.lt.s32.totalorder %s2008_s26, %s2002_s24 }
  0x1a   : > { %1681 = vmatprep.subr.mxu0 %v858_v14  ;;  %v853_v22 = vld [vmem:[%s3026_s1 + $0xc0] sm:$0xff]  ;;  %v2241_v27 = vld [vmem:[%s2150_s28 + $0x48] sm:$0xff]  ;;  %v848_v29 = vld [vmem:[%s3026_s1 + $0x98] sm:$0xff]  ;;  %p2005_p13 = pneg %p2004_p12 }
  0x1b   : > { %435 = vperm.xlu0 %1900, %v2161_v4   ;;  %1882 = vset.pattern.permute.xlu1 %v2066_v5  ;;  %v849_v28 = vld [vmem:[%s3026_s1 + $0xa0] sm:$0xff]  ;;  %v2252_v30 = vld [vmem:[%s2150_s28 + $0x68] sm:$0xff]  ;;  %v847_v32 = vld [vmem:[%s3026_s1 + $0x90] sm:$0xff]  ;;  %p2011_p2 = por %p2010_p1, %p2009_p0 }
  0x1c   : > { %590 = vperm.xlu1 %1882, %v2156_v3   ;;  %1682 = vmatpush3.msra.mxu0 %v858_v14  ;;  %v846_v33 = vld [vmem:[%s3026_s1 + $0x88] sm:$0xff]  ;;  %v2264_v34 = vld [vmem:[%s2150_s28 + $0x10] sm:$0xff]  ;;  %v845_v35 = vld [vmem:[%s3026_s1 + $0x80] sm:$0xff] }
  0x1d   : > { %1683 = vmatprep.subr.mxu0 %v857_v16  ;;  %v2291_v36 = vld [vmem:[%s2150_s28 + $0x30] sm:$0xff]  ;;  %v524_v37 = vld [vmem:[%s3026_s1 + $0x78] sm:$0xff]  ;;  %v522_v40 = vld [vmem:[%s3026_s1 + $0x68] sm:$0xff]  ;;  %p2012_p3 = pnand %p2011_p2, %p2005_p13 }
  0x1e   : > { %1684 = vmatpush3.msra.mxu0 %v857_v16  ;;  %v2303_v38 = vld [vmem:[%s2150_s28 + $0x50] sm:$0xff]  ;;  %1733 = vmatprep.subr.mxu1 %v524_v37  ;;  %v521_v41 = vld [vmem:[%s3026_s1 + $0x60] sm:$0xff]  ;;  %v520_v42 = vld [vmem:[%s3026_s1 + $0x58] sm:$0xff] }
  0x1f   : > { %447 = vperm.xlu0 %1900, %v2167_v6   ;;  %1685 = vmatprep.subr.mxu0 %v856_v18  ;;  %v523_v39 = vld [vmem:[%s3026_s1 + $0x70] sm:$0xff]  ;;  %v518_v45 = vld [vmem:[%s3026_s1 + $0x48] sm:$0xff]  ;;  %v517_v46 = vld [vmem:[%s3026_s1 + $0x40] sm:$0xff] }
  0x20   : > { %1883 = vset.pattern.permute.xlu1 %v2067_v8  ;;  %1686 = vmatpush3.msra.mxu0 %v856_v18  ;;  %v2322_v43 = vld [vmem:[%s2150_s28 + $0x70] sm:$0xff]  ;;  %v516_v47 = vld [vmem:[%s3026_s1 + $0x38] sm:$0xff]  ;;  %v514_v49 = vld [vmem:[%s3026_s1 + $0x28] sm:$0xff] }
  0x21   : > { %193 = vperm.xlu1 %1883, %v2170_v7   ;;  %1687 = vmatprep.subr.mxu0 %v855_v20  ;;  %v519_v44 = vld [vmem:[%s3026_s1 + $0x50] sm:$0xff]  ;;  %v513_v50 = vld [vmem:[%s3026_s1 + $0x20] sm:$0xff]  ;;  %v512_v51 = vld [vmem:[%s3026_s1 + $0x18] sm:$0xff] }
  0x22   : > { %1688 = vmatpush3.msra.mxu0 %v855_v20  ;;  %1734 = vmatpush3.msra.mxu1 %v524_v37  ;;  %v515_v48 = vld [vmem:[%s3026_s1 + $0x30] sm:$0xff]  ;;  %v510_v53 = vld [vmem:[%s3026_s1 + $0x8] sm:$0xff]  ;;  %v509_v54 = vld [vmem:[%s3026_s1] sm:$0xff] }
  0x23   : > { %1941 = vset.pattern.permute.xlu0 %v2068_v9  ;;  %1689 = vmatprep.subr.mxu0 %v854_v21  ;;  %v511_v52 = vld [vmem:[%s3026_s1 + $0x10] sm:$0xff] }
  0x24   : > { %254 = vperm.xlu0 %1941, %v2156_v3   ;;  %1690 = vmatpush3.msra.mxu0 %v854_v21  ;;  %v187_v21 = vlaneseq }
  0x25   : > { %1884 = vset.pattern.permute.xlu1 %v2069_v10  ;;  %1691 = vmatprep.subr.mxu0 %v853_v22 }
  0x26   : > { %334 = vperm.xlu1 %1884, %v2156_v3   ;;  %1692 = vmatpush3.msra.mxu0 %v853_v22 }
  0x27   : > { %1693 = vmatprep.subr.mxu0 %v852_v23  ;;  %1735 = vmatprep.subr.mxu1 %v523_v39 }
  0x28   : > { %257 = vperm.xlu0 %1941, %v2170_v7   ;;  %1694 = vmatpush3.msra.mxu0 %v852_v23  ;;  %v2436_v23 = vand.u32 127, %v187_v21 }
  0x29   : > { %1695 = vmatprep.subr.mxu0 %v851_v25  ;;  %1736 = vmatpush3.msra.mxu1 %v523_v39 }
  0x2a   : > { %1885 = vset.pattern.permute.xlu1 %v2066_v5  ;;  %1696 = vmatpush3.msra.mxu0 %v851_v25 }
  0x2b   : > { %593 = vperm.xlu1 %1885, %v2170_v7   ;;  %1697 = vmatprep.subr.mxu0 %v850_v26 }
  0x2c   : > { %266 = vperm.xlu0 %1941, %v2184_v12   ;;  %1698 = vmatpush3.msra.mxu0 %v850_v26 }
  0x2d   : > { %1699 = vmatprep.subr.mxu0 %v849_v28  ;;  %1737 = vmatprep.subr.mxu1 %v522_v40 }
  0x2e   : > { %1700 = vmatpush3.msra.mxu0 %v849_v28  ;;  %1738 = vmatpush3.msra.mxu1 %v522_v40 }
  0x2f   : > { %1886 = vset.pattern.permute.xlu1 %v2070_v17  ;;  %1701 = vmatprep.subr.mxu0 %v848_v29 }
  0x30   : > { %278 = vperm.xlu0 %1941, %v2196_v15   ;;  %670 = vperm.xlu1 %1886, %v2156_v3  }
  0x31   : > { %1702 = vmatpush3.msra.mxu0 %v848_v29  ;;  %1739 = vmatprep.subr.mxu1 %v521_v41  ;;  %v2072_v29 = vmov 1.0  }
  0x32   : > { %1703 = vmatprep.subr.mxu0 %v847_v32  ;;  %1740 = vmatpush3.msra.mxu1 %v521_v41 }
  0x33   : > { %1704 = vmatpush3.msra.mxu0 %v847_v32  ;;  %1741 = vmatprep.subr.mxu1 %v520_v42 }
  0x34   : > { %290 = vperm.xlu0 %1941, %v2208_v19   ;;  %1887 = vset.pattern.permute.xlu1 %v2065_v1 }
  0x35   : > { %414 = vperm.xlu1 %1887, %v2156_v3   ;;  %1705 = vmatprep.subr.mxu0 %v846_v33 }
  0x36   : > { %1706 = vmatpush3.msra.mxu0 %v846_v33  ;;  %1742 = vmatpush3.msra.mxu1 %v520_v42 }
  0x37   : > { %1707 = vmatprep.subr.mxu0 %v845_v35  ;;  %1743 = vmatprep.subr.mxu1 %v519_v44 }
  0x38   : > { %1943 = vset.pattern.permute.xlu0 %v2064_v0  ;;  %1708 = vmatpush3.msra.mxu0 %v845_v35 }
  0x39   : > { %529 = vperm.xlu0 %1943, %v2170_v7   ;;  %1888 = vset.pattern.permute.xlu1 %v2070_v17 }
  0x3a   : > { %673 = vperm.xlu1 %1888, %v2170_v7   ;;  %1744 = vmatpush3.msra.mxu1 %v519_v44 }
  0x3b   : > { %1745 = vmatprep.subr.mxu1 %v518_v45 }
  0x3c   : > { %1746 = vmatpush3.msra.mxu1 %v518_v45 }
  0x3d   : > { %541 = vperm.xlu0 %1943, %v2230_v24   ;;  %1747 = vmatprep.subr.mxu1 %v517_v46 }
  0x3e   : > { %1889 = vset.pattern.permute.xlu1 %v2065_v1  ;;  %1748 = vmatpush3.msra.mxu1 %v517_v46 }
  0x3f   : > { %417 = vperm.xlu1 %1889, %v2170_v7   ;;  %1749 = vmatprep.subr.mxu1 %v516_v47 }
  0x40   : > { %1750 = vmatpush3.msra.mxu1 %v516_v47 }
  0x41   : > { %553 = vperm.xlu0 %1943, %v2241_v27   ;;  %1751 = vmatprep.subr.mxu1 %v515_v48 }
  0x42   : > { %1752 = vmatpush3.msra.mxu1 %v515_v48 }
  0x43   : > { %1890 = vset.pattern.permute.xlu1 %v2071_v31  ;;  %1753 = vmatprep.subr.mxu1 %v514_v49 }
  0x44   : > { %753 = vperm.xlu1 %1890, %v2170_v7   ;;  %1754 = vmatpush3.msra.mxu1 %v514_v49 }
  0x45   : > { %565 = vperm.xlu0 %1943, %v2252_v30   ;;  %1755 = vmatprep.subr.mxu1 %v513_v50 }
  0x46   : > { %1756 = vmatpush3.msra.mxu1 %v513_v50 }
  0x47   : > { %1757 = vmatprep.subr.mxu1 %v512_v51 }
  0x48   : > { %1891 = vset.pattern.permute.xlu1 %v2068_v9  ;;  %1758 = vmatpush3.msra.mxu1 %v512_v51 }
  0x49   : > { %1948 = vset.pattern.permute.xlu0 %v2071_v31  ;;  %260 = vperm.xlu1 %1891, %v2264_v34  }
  0x4a   : > { %750 = vperm.xlu0 %1948, %v2156_v3   ;;  %1759 = vmatprep.subr.mxu1 %v511_v52 }
  0x4b   : > { %1760 = vmatpush3.msra.mxu1 %v511_v52 }
  0x4c   : > { %1761 = vmatprep.subr.mxu1 %v510_v53 }
  0x4d   : > { %1892 = vset.pattern.permute.xlu1 %v2064_v0  ;;  %1762 = vmatpush3.msra.mxu1 %v510_v53 }
  0x4e   : > { %762 = vperm.xlu0 %1948, %v2184_v12   ;;  %532 = vperm.xlu1 %1892, %v2264_v34  }
  0x4f   : > { %1763 = vmatprep.subr.mxu1 %v509_v54 }
  0x50   : > { %1764 = vmatpush3.msra.mxu1 %v509_v54 }
  0x52   : > { %774 = vperm.xlu0 %1948, %v2196_v15   ;;  %1893 = vset.pattern.permute.xlu1 %v2067_v8 }
  0x53   : > { %199 = vperm.xlu1 %1893, %v2153_v2  }
  0x56   : > { %786 = vperm.xlu0 %1948, %v2208_v19  }
  0x57   : > { %1894 = vset.pattern.permute.xlu1 %v2068_v9 }
  0x58   : > { %263 = vperm.xlu1 %1894, %v2153_v2  }
  0x5a   : > { %1953 = vset.pattern.permute.xlu0 %v2067_v8 }
  0x5b   : > { %190 = vperm.xlu0 %1953, %v2156_v3  }
  0x5c   : > { %1895 = vset.pattern.permute.xlu1 %v2064_v0 }
  0x5d   : > { %535 = vperm.xlu1 %1895, %v2153_v2  }
  0x5f   : > { %196 = vperm.xlu0 %1953, %v2264_v34  }
  0x61   : > { %1896 = vset.pattern.permute.xlu1 %v2066_v5 }
  0x62   : > { %599 = vperm.xlu1 %1896, %v2153_v2  }
  0x63   : > { %205 = vperm.xlu0 %1953, %v2230_v24  }
  0x66   : > { %1897 = vset.pattern.permute.xlu1 %v2069_v10 }
  0x67   : > { %208 = vperm.xlu0 %1953, %v2291_v36   ;;  %343 = vperm.xlu1 %1897, %v2153_v2  }
  0x6b   : > { %217 = vperm.xlu0 %1953, %v2241_v27   ;;  %1898 = vset.pattern.permute.xlu1 %v2065_v1 }
  0x6c   : > { %420 = vperm.xlu1 %1898, %v2264_v34  }
  0x6f   : > { %220 = vperm.xlu0 %1953, %v2303_v38  }
  0x70   : > { %1899 = vset.pattern.permute.xlu1 %v2071_v31 }
  0x71   : > { %756 = vperm.xlu1 %1899, %v2264_v34  }
  0x73   : > { %229 = vperm.xlu0 %1953, %v2252_v30  }
  0x75   : > { %759 = vperm.xlu1 %1899, %v2153_v2  }
  0x77   : > { %232 = vperm.xlu0 %1953, %v2322_v43  }
  0x79   : > { %1901 = vset.pattern.permute.xlu1 %v2067_v8 }
  0x7a   : > { %202 = vperm.xlu1 %1901, %v2184_v12  }
  0x7b   : > { %1956 = vset.pattern.permute.xlu0 %v2066_v5 }
  0x7c   : > { %596 = vperm.xlu0 %1956, %v2264_v34  }
  0x7e   : > { %1902 = vset.pattern.permute.xlu1 %v2064_v0 }
  0x7f   : > { %538 = vperm.xlu1 %1902, %v2184_v12  }
  0x80   : > { %608 = vperm.xlu0 %1956, %v2291_v36  }
  0x83   : > { %1903 = vset.pattern.permute.xlu1 %v2066_v5 }
  0x84   : > { %620 = vperm.xlu0 %1956, %v2303_v38   ;;  %602 = vperm.xlu1 %1903, %v2184_v12  }
  0x88   : > { %632 = vperm.xlu0 %1956, %v2322_v43   ;;  %1904 = vset.pattern.permute.xlu1 %v2068_v9 }
  0x89   : > { %269 = vperm.xlu1 %1904, %v2230_v24  }
  0x8c   : > { %1959 = vset.pattern.permute.xlu0 %v2069_v10 }
  0x8d   : > { %337 = vperm.xlu0 %1959, %v2170_v7   ;;  %1905 = vset.pattern.permute.xlu1 %v2069_v10 }
  0x8e   : > { %346 = vperm.xlu1 %1905, %v2184_v12  }
  0x91   : > { %340 = vperm.xlu0 %1959, %v2264_v34  }
  0x92   : > { %1906 = vset.pattern.permute.xlu1 %v2066_v5  ;;  %v2378_v55 = vpop.permute.xlu1 %526  ;;  %v2380_v56 = vpop.permute.xlu0 %423 }
  0x93   : > { %605 = vperm.xlu1 %1906, %v2230_v24   ;;  %vm573_vm4 = vcmp.eq.s32.totalorder %v2436_v23, %v2378_v55 }
  0x95   : > { %349 = vperm.xlu0 %1959, %v2230_v24  }
  0x96   : > { %v2384_v57 = vpop.permute.xlu0 %435 }
  0x97   : > { %1907 = vset.pattern.permute.xlu1 %v2070_v17  ;;  %v591_v58 = vpop.permute.xlu1 %590 }
  0x98   : > { %682 = vperm.xlu1 %1907, %v2184_v12   ;;  %vm637_vm1 = vcmp.eq.s32.totalorder %v2436_v23, %v591_v58 }
  0x99   : > { %352 = vperm.xlu0 %1959, %v2291_v36   ;;  %vm653_vm7 = vmor %vm573_vm4, %vm637_vm1 }
  0x9a   : > { %v2389_v59 = vpop.permute.xlu0 %447 }
  0x9c   : > { %1908 = vset.pattern.permute.xlu1 %v2065_v1  ;;  %v2392_v60 = vpop.permute.xlu1 %193 }
  0x9d   : > { %361 = vperm.xlu0 %1959, %v2241_v27   ;;  %426 = vperm.xlu1 %1908, %v2184_v12  }
  0x9f   : > { %v2396_v61 = vpop.permute.xlu0 %254 }
  0xa0   : > { %vm301_vm14 = vcmp.eq.s32.totalorder %v2436_v23, %v2396_v61 }
  0xa1   : > { %364 = vperm.xlu0 %1959, %v2303_v38   ;;  %1909 = vset.pattern.permute.xlu1 %v2070_v17  ;;  %v2400_v62 = vpop.permute.xlu1 %334 }
  0xa2   : > { %685 = vperm.xlu1 %1909, %v2230_v24  }
  0xa3   : > { %v2403_v63 = vpop.permute.xlu0 %257 }
  0xa5   : > { %373 = vperm.xlu0 %1959, %v2252_v30  }
  0xa6   : > { %1910 = vset.pattern.permute.xlu1 %v2065_v1  ;;  %v594_v3 = vpop.permute.xlu1 %593 }
  0xa7   : > { %429 = vperm.xlu1 %1910, %v2230_v24   ;;  %v2408_v7 = vpop.permute.xlu0 %266  ;;  %vm638_vm2 = vcmp.eq.s32.totalorder %v2436_v23, %v594_v3 }
  0xa9   : > { %376 = vperm.xlu0 %1959, %v2322_v43  }
  0xab   : > { %1911 = vset.pattern.permute.xlu1 %v2071_v31  ;;  %v671_v11 = vpop.permute.xlu1 %670  ;;  %v2412_v12 = vpop.permute.xlu0 %278 }
  0xac   : > { %765 = vperm.xlu1 %1911, %v2230_v24   ;;  %vm717_vm3 = vcmp.eq.s32.totalorder %v2436_v23, %v671_v11 }
  0xad   : > { %1962 = vset.pattern.permute.xlu0 %v2070_v17  ;;  %vm733_vm9 = vmor %vm653_vm7, %vm717_vm3  ;;  %vm238_vm7 = vcmp.eq.s32.totalorder %v2436_v23, %v2392_v60 }
  0xae   : > { %676 = vperm.xlu0 %1962, %v2264_v34  }
  0xaf   : > { %v2417_v13 = vpop.permute.xlu0 %290 }
  0xb0   : > { %1912 = vset.pattern.permute.xlu1 %v2068_v9  ;;  %v2420_v14 = vpop.permute.xlu1 %414 }
  0xb1   : > { %272 = vperm.xlu1 %1912, %v2291_v36   ;;  %vm461_vm3 = vcmp.eq.s32.totalorder %v2436_v23, %v2420_v14 }
  0xb2   : > { %679 = vperm.xlu0 %1962, %v2153_v2  }
  0xb4   : > { %v530_v16 = vpop.permute.xlu0 %529 }
  0xb5   : > { %1913 = vset.pattern.permute.xlu1 %v2064_v0  ;;  %v674_v18 = vpop.permute.xlu1 %673  ;;  %vm574_vm0 = vcmp.eq.s32.totalorder %v2436_v23, %v530_v16 }
  0xb6   : > { %544 = vperm.xlu1 %1913, %v2291_v36   ;;  %688 = vperm.xlu0 %1962, %v2291_v36   ;;  %vm654_vm5 = vmor %vm574_vm0, %vm638_vm2  ;;  %vm718_vm6 = vcmp.eq.s32.totalorder %v2436_v23, %v674_v18  ;;  %vm381_vm0 = vcmp.eq.s32.totalorder %v2436_v23, %v2400_v62 }
  0xb7   : > { %vm734_vm10 = vmor %vm654_vm5, %vm718_vm6  ;;  %vm302_vm5 = vcmp.eq.s32.totalorder %v2436_v23, %v2403_v63  ;;  %v2556_v63 = vld [vmem:[%s2150_s28 + $0x78] sm:$0xff]  ;;  %s1474_s28 = scalar_lea.sflag [#allocation3], %s162_s5 }
  0xb8   : > { %v2427_v20 = vpop.permute.xlu0 %541 }
  0xba   : > { %1914 = vset.pattern.permute.xlu1 %v2067_v8  ;;  %v2430_v22 = vpop.permute.xlu1 %417  ;;  %691 = vperm.xlu0 %1962, %v2161_v4  }
  0xbb   : > { %211 = vperm.xlu1 %1914, %v2161_v4  }
  0xbc   : > { %v2434_v2 = vpop.permute.xlu0 %553 }
  0xbe   : > { %700 = vperm.xlu0 %1962, %v2303_v38  }
  0xbf   : > { %1915 = vset.pattern.permute.xlu1 %v2068_v9  ;;  %v754_v24 = vpop.permute.xlu1 %753 }
  0xc0   : > { %275 = vperm.xlu1 %1915, %v2161_v4   ;;  %v2442_v25 = vpop.permute.xlu0 %565  ;;  %vm798_vm8 = vcmp.eq.s32.totalorder %v2436_v23, %v754_v24 }
  0xc1   : > { %vm814_vm13 = vmor %vm734_vm10, %vm798_vm8 }
  0xc2   : > { %703 = vperm.xlu0 %1962, %v2167_v6   ;;  %vm318_vm8 = vmor %vm238_vm7, %vm302_vm5 }
  0xc4   : > { %1916 = vset.pattern.permute.xlu1 %v2064_v0  ;;  %v2452_v26 = vpop.permute.xlu1 %260 }
  0xc5   : > { %v751_v28 = vpop.permute.xlu0 %750  ;;  %547 = vperm.xlu1 %1916, %v2161_v4  }
  0xc6   : > { %vm797_vm11 = vcmp.eq.s32.totalorder %v2436_v23, %v751_v28  ;;  %712 = vperm.xlu0 %1962, %v2322_v43  }
  0xc7   : > { %vm813_vm12 = vmor %vm733_vm9, %vm797_vm11 }
  0xc8   : > { %1709 = vmatprep.mubr.msk.f32.mxu0 %vm813_vm12, %v2072_v29 }
  0xc9   : > { %1917 = vset.pattern.permute.xlu1 %v2066_v5  ;;  %1710 = vmatmul.mubr.msk.f32.vlgmr.msra.gmra.mxu0 %vm814_vm13, %v2072_v29  ;;  %v2461_v32 = vpop.permute.xlu1 %532  ;;  %v2463_v33 = vpop.permute.xlu0 %762  ;;  %vm462_vm13 = vcmp.eq.s32.totalorder %v2436_v23, %v2430_v22 }
  0xca   : > { %611 = vperm.xlu1 %1917, %v2161_v4   ;;  %715 = vperm.xlu0 %1962, %v2556_v63  }
  0xcd   : > { %v2466_v34 = vpop.permute.xlu0 %774 }
  0xce   : > { %1918 = vset.pattern.permute.xlu1 %v2069_v10  ;;  %v200_v35 = vpop.permute.xlu1 %199  ;;  %1968 = vset.pattern.permute.xlu0 %v2065_v1 }
  0xcf   : > { %355 = vperm.xlu1 %1918, %v2161_v4   ;;  %vm240_vm9 = vcmp.eq.s32.totalorder %v2436_v23, %v200_v35  ;;  %459 = vperm.xlu0 %1968, %v2556_v63  }
  0xd1   : > { %v2470_v37 = vpop.permute.xlu0 %786 }
  0xd3   : > { %1919 = vset.pattern.permute.xlu1 %v2065_v1  ;;  %v264_v39 = vpop.permute.xlu1 %263  ;;  %1969 = vset.pattern.permute.xlu0 %v2071_v31 }
  0xd4   : > { %432 = vperm.xlu1 %1919, %v2291_v36   ;;  %vm304_vm6 = vcmp.eq.s32.totalorder %v2436_v23, %v264_v39 }
  0xd5   : > { %vm2541_vm10 = vmor %vm240_vm9, %vm304_vm6 }
  0xd6   : > { %v191_v40 = vpop.permute.xlu0 %190 }
  0xd7   : > { %vm237_vm15 = vcmp.eq.s32.totalorder %v2436_v23, %v191_v40 }
  0xd8   : > { %vm317_vm1 = vmor %vm237_vm15, %vm301_vm14  ;;  %1920 = vset.pattern.permute.xlu1 %v2071_v31  ;;  %v2480_v41 = vpop.permute.xlu1 %535 }
  0xd9   : > { %768 = vperm.xlu1 %1920, %v2291_v36   ;;  %vm397_vm2 = vmor %vm317_vm1, %vm381_vm0  ;;  %vm303_vm0 = vcmp.eq.s32.totalorder %v2436_v23, %v2452_v26 }
  0xda   : > { %v197_v42 = vpop.permute.xlu0 %196  ;;  %vm477_vm4 = vmor %vm397_vm2, %vm461_vm3  ;;  %vm464_vm3 = vcmp.eq.s32.totalorder %v2436_v23, %v2380_v56 }
  0xdb   : > { %1765 = vmatprep.mubr.msk.f32.mxu1 %vm477_vm4, %v2072_v29  ;;  %vm239_vm11 = vcmp.eq.s32.totalorder %v2436_v23, %v197_v42 }
  0xdc   : > { %vm319_vm2 = vmor %vm239_vm11, %vm303_vm0 }
  0xdd   : > { %771 = vperm.xlu1 %1920, %v2161_v4   ;;  %v2487_v44 = vpop.permute.xlu1 %599 }
  0xde   : > { %v2489_v45 = vpop.permute.xlu0 %205 }
  0xe1   : > { %1921 = vset.pattern.permute.xlu1 %v2067_v8 }
  0xe2   : > { %214 = vperm.xlu1 %1921, %v2196_v15   ;;  %v344_v46 = vpop.permute.xlu1 %343  ;;  %v2493_v36 = vpop.permute.xlu0 %208 }
  0xe3   : > { %vm384_vm14 = vcmp.eq.s32.totalorder %v2436_v23, %v344_v46 }
  0xe4   : > { %vm400_vm4 = vmor %vm2541_vm10, %vm384_vm14  ;;  %vm305_vm10 = vcmp.eq.s32.totalorder %v2436_v23, %v2408_v7 }
  0xe5   : > { %vm480_vm9 = vmor %vm400_vm4, %vm464_vm3 }
  0xe6   : > { %1922 = vset.pattern.permute.xlu1 %v2064_v0  ;;  %v2496_v47 = vpop.permute.xlu0 %217 }
  0xe7   : > { %550 = vperm.xlu1 %1922, %v2196_v15   ;;  %v421_v48 = vpop.permute.xlu1 %420 }
  0xe8   : > { %vm463_vm6 = vcmp.eq.s32.totalorder %v2436_v23, %v421_v48 }
  0xea   : > { %v2499_v49 = vpop.permute.xlu0 %220 }
  0xeb   : > { %1923 = vset.pattern.permute.xlu1 %v2066_v5 }
  0xec   : > { %614 = vperm.xlu1 %1923, %v2196_v15   ;;  %v2503_v4 = vpop.permute.xlu1 %756 }
  0xee   : > { %v2505_v50 = vpop.permute.xlu0 %229 }
  0xf0   : > { %1924 = vset.pattern.permute.xlu1 %v2068_v9  ;;  %v2508_v51 = vpop.permute.xlu1 %759 }
  0xf1   : > { %281 = vperm.xlu1 %1924, %v2241_v27  }
  0xf2   : > { %v2511_v52 = vpop.permute.xlu0 %232 }
  0xf5   : > { %1925 = vset.pattern.permute.xlu1 %v2069_v10  ;;  %v203_v53 = vpop.permute.xlu1 %202 }
  0xf6   : > { %358 = vperm.xlu1 %1925, %v2196_v15   ;;  %vm241_vm11 = vcmp.eq.s32.totalorder %v2436_v23, %v203_v53 }
  0xf7   : > { %v2515_v54 = vpop.permute.xlu0 %596 }
  0xfa   : > { %1926 = vset.pattern.permute.xlu1 %v2066_v5  ;;  %v2518_v55 = vpop.permute.xlu1 %538 }
  0xfb   : > { %617 = vperm.xlu1 %1926, %v2241_v27   ;;  %v2521_v58 = vpop.permute.xlu0 %608 }
  0xff   : > { %1927 = vset.pattern.permute.xlu1 %v2070_v17  ;;  %v2524_v61 = vpop.permute.xlu1 %602  ;;  %v2526_v62 = vpop.permute.xlu0 %620 }
 0x100   : > { %694 = vperm.xlu1 %1927, %v2196_v15  }
 0x103   : > { %v2529_v3 = vpop.permute.xlu0 %632 }
 0x104   : > { %1928 = vset.pattern.permute.xlu1 %v2065_v1  ;;  %v2532_v11 = vpop.permute.xlu1 %269 }
 0x105   : > { %438 = vperm.xlu1 %1928, %v2196_v15  }
 0x108   : > { %v338_v14 = vpop.permute.xlu0 %337 }
 0x109   : > { %vm382_vm12 = vcmp.eq.s32.totalorder %v2436_v23, %v338_v14  ;;  %1929 = vset.pattern.permute.xlu1 %v2070_v17  ;;  %v347_v15 = vpop.permute.xlu1 %346 }
 0x10a   : > { %vm398_vm15 = vmor %vm318_vm8, %vm382_vm12  ;;  %697 = vperm.xlu1 %1929, %v2241_v27   ;;  %vm385_vm12 = vcmp.eq.s32.totalorder %v2436_v23, %v347_v15 }
 0x10b   : > { %vm478_vm1 = vmor %vm398_vm15, %vm462_vm13 }
 0x10c   : > { %v341_v60 = vpop.permute.xlu0 %340  ;;  %1766 = vmatmul.mubr.msk.f32.vlgmr.msra.gmra.mxu1 %vm478_vm1, %v2072_v29  ;;  %vm321_vm13 = vmor %vm241_vm11, %vm305_vm10  ;;  %vm242_vm1 = vcmp.eq.s32.totalorder %v2436_v23, %v2489_v45  ;;  %vm576_vm10 = vcmp.eq.s32.totalorder %v2436_v23, %v2480_v41  ;;  %vm575_vm11 = vcmp.eq.s32.totalorder %v2436_v23, %v2461_v32 }
 0x10d   : > { %vm383_vm5 = vcmp.eq.s32.totalorder %v2436_v23, %v341_v60  ;;  %vm401_vm14 = vmor %vm321_vm13, %vm385_vm12 }
 0x10e   : > { %vm399_vm7 = vmor %vm319_vm2, %vm383_vm5  ;;  %1930 = vset.pattern.permute.xlu1 %v2065_v1  ;;  %v2566_v18 = vpop.permute.xlu1 %605  ;;  %vm306_vm2 = vcmp.eq.s32.totalorder %v2436_v23, %v2532_v11 }
 0x10f   : > { %vm479_vm8 = vmor %vm399_vm7, %vm463_vm6  ;;  %441 = vperm.xlu1 %1930, %v2241_v27  }
 0x110   : > { %v350_v21 = vpop.permute.xlu0 %349  ;;  %1768 = vmatprep.mubr.msk.f32.mxu1 %vm479_vm8, %v2072_v29  ;;  %vm322_vm4 = vmor %vm242_vm1, %vm306_vm2  ;;  %vm640_vm8 = vcmp.eq.s32.totalorder %v2436_v23, %v2487_v44 }
 0x111   : > { %1769 = vmatmul.mubr.msk.f32.gmra.mxu1 %vm480_vm9, %v2072_v29  ;;  %vm386_vm3 = vcmp.eq.s32.totalorder %v2436_v23, %v350_v21  ;;  %vm639_vm9 = vcmp.eq.s32.totalorder %v2436_v23, %v2515_v54  ;;  %vm2615_vm12 = vmor %vm576_vm10, %vm640_vm8  ;;  %vm800_vm10 = vcmp.eq.s32.totalorder %v2436_v23, %v2508_v51 }
 0x112   : > { %vm402_vm5 = vmor %vm322_vm4, %vm386_vm3  ;;  %vm577_vm3 = vcmp.eq.s32.totalorder %v2436_v23, %v2518_v55 }
 0x113   : > { %1931 = vset.pattern.permute.xlu1 %v2071_v31  ;;  %v683_v56 = vpop.permute.xlu1 %682  ;;  %vm655_vm13 = vmor %vm575_vm11, %vm639_vm9  ;;  %vm578_vm9 = vcmp.eq.s32.totalorder %v2436_v23, %v2427_v20  ;;  %vm642_vm11 = vcmp.eq.s32.totalorder %v2436_v23, %v2566_v18 }
 0x114   : > { %777 = vperm.xlu1 %1931, %v2241_v27   ;;  %v2575_v22 = vpop.permute.xlu0 %352  ;;  %vm721_vm1 = vcmp.eq.s32.totalorder %v2436_v23, %v683_v56 }
 0x118   : > { %1932 = vset.pattern.permute.xlu1 %v2068_v9  ;;  %v427_v24 = vpop.permute.xlu1 %426  ;;  %v2583_v26 = vpop.permute.xlu0 %361 }
 0x119   : > { %vm465_vm15 = vcmp.eq.s32.totalorder %v2436_v23, %v427_v24  ;;  %284 = vperm.xlu1 %1932, %v2303_v38  }
 0x11a   : > { %vm481_vm0 = vmor %vm401_vm14, %vm465_vm15  ;;  %vm641_vm14 = vcmp.eq.s32.totalorder %v2436_v23, %v2524_v61 }
 0x11b   : > { %1771 = vmatprep.mubr.msk.f32.mxu1 %vm481_vm0, %v2072_v29  ;;  %vm799_vm0 = vcmp.eq.s32.totalorder %v2436_v23, %v2503_v4 }
 0x11c   : > { %v2588_v27 = vpop.permute.xlu0 %364 }
 0x11d   : > { %1933 = vset.pattern.permute.xlu1 %v2064_v0  ;;  %v686_v7 = vpop.permute.xlu1 %685 }
 0x11e   : > { %556 = vperm.xlu1 %1933, %v2303_v38  }
 0x120   : > { %v2597_v28 = vpop.permute.xlu0 %373 }
 0x122   : > { %1934 = vset.pattern.permute.xlu1 %v2067_v8  ;;  %v430_v35 = vpop.permute.xlu1 %429 }
 0x123   : > { %vm466_vm6 = vcmp.eq.s32.totalorder %v2436_v23, %v430_v35  ;;  %223 = vperm.xlu1 %1934, %v2167_v6  }
 0x124   : > { %vm482_vm7 = vmor %vm402_vm5, %vm466_vm6  ;;  %v2602_v39 = vpop.permute.xlu0 %376  ;;  %vm801_vm6 = vcmp.eq.s32.totalorder %v2436_v23, %v2463_v33 }
 0x125   : > { %1772 = vmatmul.mubr.msk.f32.gmra.mxu1 %vm482_vm7, %v2072_v29  ;;  %vm657_vm5 = vmor %vm577_vm3, %vm641_vm14  ;;  %vm722_vm14 = vcmp.eq.s32.totalorder %v2436_v23, %v686_v7 }
 0x126   : > { %vm737_vm7 = vmor %vm657_vm5, %vm721_vm1 }
 0x127   : > { %1935 = vset.pattern.permute.xlu1 %v2068_v9  ;;  %v766_v40 = vpop.permute.xlu1 %765  ;;  %vm817_vm1 = vmor %vm737_vm7, %vm801_vm6  ;;  %vm387_vm6 = vcmp.eq.s32.totalorder %v2436_v23, %v2575_v22 }
 0x128   : > { %287 = vperm.xlu1 %1935, %v2167_v6  }
 0x129   : > { %v677_v42 = vpop.permute.xlu0 %676 }
 0x12a   : > { %vm719_vm15 = vcmp.eq.s32.totalorder %v2436_v23, %v677_v42 }
 0x12b   : > { %vm735_vm2 = vmor %vm655_vm13, %vm719_vm15 }
 0x12c   : > { %vm815_vm4 = vmor %vm735_vm2, %vm799_vm0  ;;  %1936 = vset.pattern.permute.xlu1 %v2064_v0  ;;  %v273_v32 = vpop.permute.xlu1 %272  ;;  %vm802_vm0 = vcmp.eq.s32.totalorder %v2436_v23, %v766_v40 }
 0x12d   : > { %v680_v41 = vpop.permute.xlu0 %679  ;;  %559 = vperm.xlu1 %1936, %v2167_v6   ;;  %1712 = vmatprep.mubr.msk.f32.mxu0 %vm815_vm4, %v2072_v29  ;;  %vm658_vm2 = vmor %vm578_vm9, %vm642_vm11  ;;  %vm307_vm5 = vcmp.eq.s32.totalorder %v2436_v23, %v273_v32 }
 0x12e   : > { %vm720_vm8 = vcmp.eq.s32.totalorder %v2436_v23, %v680_v41  ;;  %vm738_vm3 = vmor %vm658_vm2, %vm722_vm14 }
 0x12f   : > { %vm736_vm13 = vmor %vm2615_vm12, %vm720_vm8  ;;  %vm243_vm12 = vcmp.eq.s32.totalorder %v2436_v23, %v2493_v36 }
 0x130   : > { %vm816_vm15 = vmor %vm736_vm13, %vm800_vm10  ;;  %vm643_vm10 = vcmp.eq.s32.totalorder %v2436_v23, %v2521_v58 }
 0x131   : > { %1937 = vset.pattern.permute.xlu1 %v2066_v5  ;;  %1713 = vmatmul.mubr.msk.f32.gmra.mxu0 %vm816_vm15, %v2072_v29  ;;  %v545_v33 = vpop.permute.xlu1 %544  ;;  %vm818_vm4 = vmor %vm738_vm3, %vm802_vm0  ;;  %vm468_vm0 = vcmp.eq.s32.totalorder %v2436_v23, %v2384_v57 }
 0x132   : > { %623 = vperm.xlu1 %1937, %v2167_v6   ;;  %1715 = vmatprep.mubr.msk.f32.mxu0 %vm817_vm1, %v2072_v29  ;;  %vm323_vm7 = vmor %vm243_vm12, %vm307_vm5  ;;  %vm579_vm11 = vcmp.eq.s32.totalorder %v2436_v23, %v545_v33  ;;  %v1280_v33 = vld [vmem:[%s3027_s2 + $0x20] sm:$0xff] }
 0x133   : > { %vm403_vm14 = vmor %vm323_vm7, %vm387_vm6 }
 0x134   : > { %vm659_vm2 = vmor %vm579_vm11, %vm643_vm10 }
 0x135   : > { %1716 = vmatmul.mubr.msk.f32.gmra.mxu0 %vm818_vm4, %v2072_v29 }
 0x136   : > { %1938 = vset.pattern.permute.xlu1 %v2069_v10  ;;  %v212_v20 = vpop.permute.xlu1 %211 }
 0x137   : > { %367 = vperm.xlu1 %1938, %v2167_v6   ;;  %vm244_vm13 = vcmp.eq.s32.totalorder %v2436_v23, %v212_v20  ;;  %v2073_v20 = vmov 0.0  }
 0x138   : > { %1789 = vmatprep.subr.mxu0 %v2073_v20  ;;  %1796 = vmatprep.subr.mxu1 %v2073_v20 }
 0x139   : > { %1790 = vmatpush3.msra.mxu0 %v1280_v33 }
 0x13a   : > { %1791 = vmatprep.subr.mxu0 %v2073_v20 }
 0x13b   : > { %1939 = vset.pattern.permute.xlu1 %v2065_v1  ;;  %v276_v44 = vpop.permute.xlu1 %275 }
 0x13c   : > { %444 = vperm.xlu1 %1939, %v2303_v38   ;;  %vm308_vm8 = vcmp.eq.s32.totalorder %v2436_v23, %v276_v44  ;;  %v1279_v44 = vld [vmem:[%s3027_s2 + $0x18] sm:$0xff] }
 0x13d   : > { %vm324_vm15 = vmor %vm244_vm13, %vm308_vm8  ;;  %1792 = vmatpush3.msra.mxu0 %v1279_v44 }
 0x140   : > { %1940 = vset.pattern.permute.xlu1 %v2071_v31  ;;  %v548_v46 = vpop.permute.xlu1 %547 }
 0x141   : > { %780 = vperm.xlu1 %1940, %v2303_v38   ;;  %vm580_vm8 = vcmp.eq.s32.totalorder %v2436_v23, %v548_v46  ;;  %v1295_v46 = vld [vmem:[%s3027_s2 + $0x98] sm:$0xff] }
 0x145   : > { %783 = vperm.xlu1 %1940, %v2167_v6   ;;  %v612_v48 = vpop.permute.xlu1 %611  ;;  %v689_v6 = vpop.permute.xlu0 %688 }
 0x146   : > { %vm723_vm4 = vcmp.eq.s32.totalorder %v2436_v23, %v689_v6  ;;  %vm644_vm5 = vcmp.eq.s32.totalorder %v2436_v23, %v612_v48  ;;  %v1294_v48 = vld [vmem:[%s3027_s2 + $0x90] sm:$0xff]  ;;  %v1292_v6 = vld [vmem:[%s3027_s2 + $0x80] sm:$0xff] }
 0x147   : > { %vm739_vm7 = vmor %vm659_vm2, %vm723_vm4  ;;  %vm390_vm2 = vcmp.eq.s32.totalorder %v2436_v23, %v2583_v26 }
 0x149   : > { %1942 = vset.pattern.permute.xlu1 %v2067_v8  ;;  %v692_v36 = vpop.permute.xlu0 %691 }
 0x14a   : > { %226 = vperm.xlu1 %1942, %v2208_v19   ;;  %v356_v4 = vpop.permute.xlu1 %355  ;;  %vm724_vm11 = vcmp.eq.s32.totalorder %v2436_v23, %v692_v36  ;;  %v1290_v36 = vld [vmem:[%s3027_s2 + $0x70] sm:$0xff] }
 0x14b   : > { %vm388_vm9 = vcmp.eq.s32.totalorder %v2436_v23, %v356_v4  ;;  %v1293_v4 = vld [vmem:[%s3027_s2 + $0x88] sm:$0xff] }
 0x14c   : > { %vm404_vm1 = vmor %vm324_vm15, %vm388_vm9 }
 0x14d   : > { %vm484_vm6 = vmor %vm404_vm1, %vm468_vm0  ;;  %vm246_vm1 = vcmp.eq.s32.totalorder %v2436_v23, %v2496_v47 }
 0x14e   : > { %1944 = vset.pattern.permute.xlu1 %v2064_v0  ;;  %vm660_vm9 = vmor %vm580_vm8, %vm644_vm5 }
 0x14f   : > { %562 = vperm.xlu1 %1944, %v2208_v19   ;;  %v433_v38 = vpop.permute.xlu1 %432 }
 0x150   : > { %vm467_vm3 = vcmp.eq.s32.totalorder %v2436_v23, %v433_v38  ;;  %v1291_v38 = vld [vmem:[%s3027_s2 + $0x78] sm:$0xff] }
 0x151   : > { %vm483_vm12 = vmor %vm403_vm14, %vm467_vm3 }
 0x152   : > { %1774 = vmatprep.mubr.msk.f32.mxu1 %vm483_vm12, %v2072_v29  ;;  %vm740_vm14 = vmor %vm660_vm9, %vm724_vm11 }
 0x153   : > { %1945 = vset.pattern.permute.xlu1 %v2066_v5  ;;  %1775 = vmatmul.mubr.msk.f32.gmra.mxu1 %vm484_vm6, %v2072_v29  ;;  %vm805_vm6 = vcmp.eq.s32.totalorder %v2436_v23, %v2466_v34 }
 0x154   : > { %626 = vperm.xlu1 %1945, %v2208_v19   ;;  %v769_v57 = vpop.permute.xlu1 %768 }
 0x155   : > { %vm803_vm10 = vcmp.eq.s32.totalorder %v2436_v23, %v769_v57  ;;  %v1289_v57 = vld [vmem:[%s3027_s2 + $0x68] sm:$0xff] }
 0x156   : > { %vm819_vm13 = vmor %vm739_vm7, %vm803_vm10  ;;  %vm309_vm10 = vcmp.eq.s32.totalorder %v2436_v23, %v2412_v12 }
 0x157   : > { %1718 = vmatprep.mubr.msk.f32.mxu0 %vm819_vm13, %v2072_v29 }
 0x158   : > { %1946 = vset.pattern.permute.xlu1 %v2068_v9  ;;  %v772_v51 = vpop.permute.xlu1 %771 }
 0x159   : > { %vm804_vm15 = vcmp.eq.s32.totalorder %v2436_v23, %v772_v51  ;;  %293 = vperm.xlu1 %1946, %v2252_v30   ;;  %v1288_v51 = vld [vmem:[%s3027_s2 + $0x60] sm:$0xff] }
 0x15a   : > { %vm820_vm0 = vmor %vm740_vm14, %vm804_vm15 }
 0x15b   : > { %1719 = vmatmul.mubr.msk.f32.gmra.mxu0 %vm820_vm0, %v2072_v29 }
 0x15d   : > { %1947 = vset.pattern.permute.xlu1 %v2069_v10  ;;  %v215_v53 = vpop.permute.xlu1 %214 }
 0x15e   : > { %370 = vperm.xlu1 %1947, %v2208_v19   ;;  %vm245_vm11 = vcmp.eq.s32.totalorder %v2436_v23, %v215_v53  ;;  %v1287_v53 = vld [vmem:[%s3027_s2 + $0x58] sm:$0xff] }
 0x15f   : > { %vm325_vm0 = vmor %vm245_vm11, %vm309_vm10 }
 0x162   : > { %1949 = vset.pattern.permute.xlu1 %v2066_v5  ;;  %v551_v54 = vpop.permute.xlu1 %550 }
 0x163   : > { %629 = vperm.xlu1 %1949, %v2252_v30   ;;  %vm581_vm7 = vcmp.eq.s32.totalorder %v2436_v23, %v551_v54  ;;  %v1286_v54 = vld [vmem:[%s3027_s2 + $0x50] sm:$0xff] }
 0x167   : > { %1950 = vset.pattern.permute.xlu1 %v2070_v17  ;;  %v615_v55 = vpop.permute.xlu1 %614 }
 0x168   : > { %706 = vperm.xlu1 %1950, %v2208_v19   ;;  %vm645_vm5 = vcmp.eq.s32.totalorder %v2436_v23, %v615_v55 }
 0x169   : > { %vm661_vm8 = vmor %vm581_vm7, %vm645_vm5  ;;  %vm582_vm5 = vcmp.eq.s32.totalorder %v2436_v23, %v2434_v2 }
 0x16c   : > { %1951 = vset.pattern.permute.xlu1 %v2065_v1  ;;  %v282_v58 = vpop.permute.xlu1 %281 }
 0x16d   : > { %vm310_vm3 = vcmp.eq.s32.totalorder %v2436_v23, %v282_v58  ;;  %450 = vperm.xlu1 %1951, %v2208_v19   ;;  %v1285_v58 = vld [vmem:[%s3027_s2 + $0x48] sm:$0xff] }
 0x16e   : > { %vm326_vm4 = vmor %vm246_vm1, %vm310_vm3 }
 0x16f   : > { %vm2700_vm12 = vmor %vm326_vm4, %vm390_vm2 }
 0x171   : > { %1952 = vset.pattern.permute.xlu1 %v2070_v17  ;;  %v359_v11 = vpop.permute.xlu1 %358 }
 0x172   : > { %709 = vperm.xlu1 %1952, %v2252_v30   ;;  %vm389_vm14 = vcmp.eq.s32.totalorder %v2436_v23, %v359_v11  ;;  %v1284_v11 = vld [vmem:[%s3027_s2 + $0x40] sm:$0xff] }
 0x173   : > { %vm405_vm1 = vmor %vm325_vm0, %vm389_vm14  ;;  %vm247_vm14 = vcmp.eq.s32.totalorder %v2436_v23, %v2499_v49 }
 0x176   : > { %1954 = vset.pattern.permute.xlu1 %v2065_v1  ;;  %v618_v47 = vpop.permute.xlu1 %617 }
 0x177   : > { %453 = vperm.xlu1 %1954, %v2252_v30  }
 0x17b   : > { %1955 = vset.pattern.permute.xlu1 %v2071_v31  ;;  %v695_v19 = vpop.permute.xlu1 %694 }
 0x17c   : > { %vm725_vm9 = vcmp.eq.s32.totalorder %v2436_v23, %v695_v19  ;;  %789 = vperm.xlu1 %1955, %v2252_v30  }
 0x17d   : > { %vm741_vm13 = vmor %vm661_vm8, %vm725_vm9 }
 0x17e   : > { %vm821_vm15 = vmor %vm741_vm13, %vm805_vm6  ;;  %vm646_vm6 = vcmp.eq.s32.totalorder %v2436_v23, %v618_v47 }
 0x17f   : > { %1721 = vmatprep.mubr.msk.f32.mxu0 %vm821_vm15, %v2072_v29  ;;  %vm662_vm9 = vmor %vm582_vm5, %vm646_vm6 }
 0x180   : > { %1957 = vset.pattern.permute.xlu1 %v2068_v9  ;;  %v439_v17 = vpop.permute.xlu1 %438 }
 0x181   : > { %vm469_vm2 = vcmp.eq.s32.totalorder %v2436_v23, %v439_v17  ;;  %296 = vperm.xlu1 %1957, %v2322_v43  }
 0x182   : > { %vm485_vm3 = vmor %vm405_vm1, %vm469_vm2 }
 0x183   : > { %1777 = vmatprep.mubr.msk.f32.mxu1 %vm485_vm3, %v2072_v29 }
 0x185   : > { %1958 = vset.pattern.permute.xlu1 %v2064_v0  ;;  %v698_v30 = vpop.permute.xlu1 %697 }
 0x186   : > { %568 = vperm.xlu1 %1958, %v2322_v43   ;;  %vm726_vm8 = vcmp.eq.s32.totalorder %v2436_v23, %v698_v30 }
 0x187   : > { %vm742_vm10 = vmor %vm662_vm9, %vm726_vm8 }
 0x189   : > { %v1711_v55 = vpop.f32.mrf.mxu0 }
 0x18a   : > { %1960 = vset.pattern.permute.xlu1 %v2067_v8  ;;  %v442_v12 = vpop.permute.xlu1 %441 }
 0x18b   : > { %vm470_vm4 = vcmp.eq.s32.totalorder %v2436_v23, %v442_v12  ;;  %235 = vperm.xlu1 %1960, %v2556_v63   ;;  %v927_v47 = vpop.f32.mrf.mxu0 }
 0x18c   : > { %vm486_vm7 = vmor %vm2700_vm12, %vm470_vm4  ;;  %vm391_vm12 = vcmp.eq.s32.totalorder %v2436_v23, %v2588_v27  ;;  %vm647_vm4 = vcmp.eq.s32.totalorder %v2436_v23, %v2526_v62 }
 0x18d   : > { %1778 = vmatmul.mubr.msk.f32.gmra.mxu1 %vm486_vm7, %v2072_v29 }
 0x18f   : > { %1961 = vset.pattern.permute.xlu1 %v2068_v9  ;;  %v778_v8 = vpop.permute.xlu1 %777 }
 0x190   : > { %vm806_vm11 = vcmp.eq.s32.totalorder %v2436_v23, %v778_v8  ;;  %299 = vperm.xlu1 %1961, %v2556_v63  }
 0x191   : > { %vm822_vm13 = vmor %vm742_vm10, %vm806_vm11  ;;  %vm472_vm11 = vcmp.eq.s32.totalorder %v2436_v23, %v2389_v59 }
 0x192   : > { %1722 = vmatmul.mubr.msk.f32.gmra.mxu0 %vm822_vm13, %v2072_v29 }
 0x194   : > { %1963 = vset.pattern.permute.xlu1 %v2064_v0  ;;  %v285_v2 = vpop.permute.xlu1 %284 }
 0x195   : > { %vm311_vm15 = vcmp.eq.s32.totalorder %v2436_v23, %v285_v2  ;;  %571 = vperm.xlu1 %1963, %v2556_v63  }
 0x196   : > { %vm327_vm0 = vmor %vm247_vm14, %vm311_vm15 }
 0x197   : > { %vm2747_vm1 = vmor %vm327_vm0, %vm391_vm12 }
 0x199   : > { %1964 = vset.pattern.permute.xlu1 %v2066_v5  ;;  %v557_v34 = vpop.permute.xlu1 %556 }
 0x19a   : > { %635 = vperm.xlu1 %1964, %v2556_v63   ;;  %vm583_vm5 = vcmp.eq.s32.totalorder %v2436_v23, %v557_v34 }
 0x19b   : > { %vm663_vm9 = vmor %vm583_vm5, %vm647_vm4 }
 0x19e   : > { %1965 = vset.pattern.permute.xlu1 %v2069_v10  ;;  %v224_v49 = vpop.permute.xlu1 %223 }
 0x19f   : > { %379 = vperm.xlu1 %1965, %v2556_v63   ;;  %vm248_vm6 = vcmp.eq.s32.totalorder %v2436_v23, %v224_v49 }
 0x1a3   : > { %1966 = vset.pattern.permute.xlu1 %v2065_v1  ;;  %v288_v0 = vpop.permute.xlu1 %287  ;;  %v701_v1 = vpop.permute.xlu0 %700 }
 0x1a4   : > { %456 = vperm.xlu1 %1966, %v2322_v43   ;;  %vm312_vm2 = vcmp.eq.s32.totalorder %v2436_v23, %v288_v0  ;;  %vm727_vm13 = vcmp.eq.s32.totalorder %v2436_v23, %v701_v1 }
 0x1a5   : > { %vm328_vm7 = vmor %vm248_vm6, %vm312_vm2 }
 0x1a6   : > { %vm743_vm0 = vmor %vm663_vm9, %vm727_vm13  ;;  %vm394_vm9 = vcmp.eq.s32.totalorder %v2436_v23, %v2597_v28 }
 0x1a8   : > { %1967 = vset.pattern.permute.xlu1 %v2071_v31  ;;  %v560_v14 = vpop.permute.xlu1 %559  ;;  %v704_v31 = vpop.permute.xlu0 %703 }
 0x1a9   : > { %792 = vperm.xlu1 %1967, %v2322_v43   ;;  %vm584_vm2 = vcmp.eq.s32.totalorder %v2436_v23, %v560_v14  ;;  %vm728_vm5 = vcmp.eq.s32.totalorder %v2436_v23, %v704_v31 }
 0x1ac   : > { %v713_v40 = vpop.permute.xlu0 %712 }
 0x1ad   : > { %795 = vperm.xlu1 %1967, %v2556_v63   ;;  %v624_v5 = vpop.permute.xlu1 %623 }
 0x1ae   : > { %vm648_vm12 = vcmp.eq.s32.totalorder %v2436_v23, %v624_v5 }
 0x1b0   : > { %v716_v45 = vpop.permute.xlu0 %715 }
 0x1b2   : > { %v368_v16 = vpop.permute.xlu1 %367 }
 0x1b3   : > { %vm392_vm3 = vcmp.eq.s32.totalorder %v2436_v23, %v368_v16 }
 0x1b4   : > { %vm408_vm8 = vmor %vm328_vm7, %vm392_vm3 }
 0x1b5   : > { %vm488_vm15 = vmor %vm408_vm8, %vm472_vm11 }
 0x1b6   : > { %vm664_vm3 = vmor %vm584_vm2, %vm648_vm12 }
 0x1b7   : > { %v445_v10 = vpop.permute.xlu1 %444 }
 0x1b8   : > { %vm471_vm10 = vcmp.eq.s32.totalorder %v2436_v23, %v445_v10 }
 0x1b9   : > { %vm487_vm14 = vmor %vm2747_vm1, %vm471_vm10  ;;  %vm250_vm10 = vcmp.eq.s32.totalorder %v2436_v23, %v2505_v50 }
 0x1ba   : > { %1780 = vmatprep.mubr.msk.f32.mxu1 %vm487_vm14, %v2072_v29  ;;  %vm744_vm1 = vmor %vm664_vm3, %vm728_vm5  ;;  %vm809_vm3 = vcmp.eq.s32.totalorder %v2436_v23, %v2470_v37 }
 0x1bb   : > { %1781 = vmatmul.mubr.msk.f32.gmra.mxu1 %vm488_vm15, %v2072_v29 }
 0x1bc   : > { %v781_v43 = vpop.permute.xlu1 %780 }
 0x1bd   : > { %vm807_vm4 = vcmp.eq.s32.totalorder %v2436_v23, %v781_v43 }
 0x1be   : > { %vm823_vm6 = vmor %vm743_vm0, %vm807_vm4 }
 0x1bf   : > { %1724 = vmatprep.mubr.msk.f32.mxu0 %vm823_vm6, %v2072_v29 }
 0x1c0   : > { %v784_v59 = vpop.permute.xlu1 %783 }
 0x1c1   : > { %vm808_vm7 = vcmp.eq.s32.totalorder %v2436_v23, %v784_v59 }
 0x1c2   : > { %vm824_vm8 = vmor %vm744_vm1, %vm808_vm7  ;;  %vm313_vm7 = vcmp.eq.s32.totalorder %v2436_v23, %v2417_v13 }
 0x1c3   : > { %1725 = vmatmul.mubr.msk.f32.gmra.mxu0 %vm824_vm8, %v2072_v29 }
 0x1c5   : > { %v227_v62 = vpop.permute.xlu1 %226 }
 0x1c6   : > { %vm249_vm4 = vcmp.eq.s32.totalorder %v2436_v23, %v227_v62 }
 0x1c7   : > { %vm329_vm8 = vmor %vm249_vm4, %vm313_vm7  ;;  %vm395_vm7 = vcmp.eq.s32.totalorder %v2436_v23, %v2602_v39 }
 0x1ca   : > { %v563_v15 = vpop.permute.xlu1 %562 }
 0x1cb   : > { %vm585_vm15 = vcmp.eq.s32.totalorder %v2436_v23, %v563_v15 }
 0x1cc   : > { %v1767_v61 = vpop.f32.mrf.mxu1 }
 0x1cd   : > { %v1078_v62 = vadd.f32 %v1767_v61, %v1711_v55  ;;  %v2930_v61 = vld [vmem:[%s3027_s2 + $0x10] sm:$0xff] }
 0x1ce   : > { %v1072_v19 = vpop.f32.mrf.mxu1 }
 0x1cf   : > { %v627_v60 = vpop.permute.xlu1 %626 }
 0x1d0   : > { %vm649_vm12 = vcmp.eq.s32.totalorder %v2436_v23, %v627_v60  ;;  %v2911_v60 = vld [vmem:[%s3027_s2] ss:$0 sm:$0xff] }
 0x1d1   : > { %vm665_vm0 = vmor %vm585_vm15, %vm649_vm12  ;;  %v1770_v30 = vpop.f32.mrf.mxu1 }
 0x1d3   : > { %v1082_v8 = vpop.f32.mrf.mxu1 }
 0x1d4   : > { %v294_v63 = vpop.permute.xlu1 %293 }
 0x1d5   : > { %vm314_vm11 = vcmp.eq.s32.totalorder %v2436_v23, %v294_v63  ;;  %v1073_v63 = vadd.f32 %v1072_v19, %v927_v47 }
 0x1d6   : > { %vm330_vm13 = vmor %vm250_vm10, %vm314_vm11 }
 0x1d7   : > { %vm2786_vm14 = vmor %vm330_vm13, %vm394_vm9 }
 0x1d9   : > { %v371_v21 = vpop.permute.xlu1 %370 }
 0x1da   : > { %vm393_vm6 = vcmp.eq.s32.totalorder %v2436_v23, %v371_v21 }
 0x1db   : > { %vm409_vm9 = vmor %vm329_vm8, %vm393_vm6 }
 0x1de   : > { %v630_v56 = vpop.permute.xlu1 %629 }
 0x1df   : > { %vm650_vm12 = vcmp.eq.s32.totalorder %v2436_v23, %v630_v56 }
 0x1e3   : > { %v707_v22 = vpop.permute.xlu1 %706 }
 0x1e4   : > { %vm729_vm2 = vcmp.eq.s32.totalorder %v2436_v23, %v707_v22  ;;  %v1157_v22 = vadd.f32 %v2911_v60, %v1078_v62 }
 0x1e5   : > { %vm745_vm5 = vmor %vm665_vm0, %vm729_vm2  ;;  %vm586_vm2 = vcmp.eq.s32.totalorder %v2436_v23, %v2442_v25  ;;  %v1773_v9 = vpop.f32.mrf.mxu1 }
 0x1e6   : > { %vm825_vm1 = vmor %vm745_vm5, %vm809_vm3  ;;  %1970 = vtanh.f32 %v1157_v22 }
 0x1e7   : > { %1727 = vmatprep.mubr.msk.f32.mxu0 %vm825_vm1, %v2072_v29  ;;  %vm666_vm3 = vmor %vm586_vm2, %vm650_vm12  ;;  %vm251_vm1 = vcmp.eq.s32.totalorder %v2436_v23, %v2511_v52  ;;  %v460_v52 = vpop.permute.xlu0 %459  ;;  %v1092_v49 = vpop.f32.mrf.mxu1 }
 0x1e8   : > { %v451_v50 = vpop.permute.xlu1 %450 }
 0x1e9   : > { %vm473_vm10 = vcmp.eq.s32.totalorder %v2436_v23, %v451_v50 }
 0x1ea   : > { %vm489_vm11 = vmor %vm409_vm9, %vm473_vm10 }
 0x1eb   : > { %1783 = vmatprep.mubr.msk.f32.mxu1 %vm489_vm11, %v2072_v29 }
 0x1ed   : > { %v710_v37 = vpop.permute.xlu1 %709 }
 0x1ee   : > { %vm730_vm0 = vcmp.eq.s32.totalorder %v2436_v23, %v710_v37 }
 0x1ef   : > { %vm746_vm4 = vmor %vm666_vm3, %vm730_vm0  ;;  %vm651_vm0 = vcmp.eq.s32.totalorder %v2436_v23, %v2529_v3  ;;  %vm476_vm3 = vcmp.eq.s32.totalorder %v2436_v23, %v460_v52 }
 0x1f1   : > { %v1714_v17 = vpop.f32.mrf.mxu0 }
 0x1f2   : > { %v454_v24 = vpop.permute.xlu1 %453  ;;  %v1088_v18 = vadd.f32 %v1770_v30, %v1714_v17 }
 0x1f3   : > { %vm474_vm13 = vcmp.eq.s32.totalorder %v2436_v23, %v454_v24  ;;  %v937_v12 = vpop.f32.mrf.mxu0 }
 0x1f4   : > { %vm490_vm15 = vmor %vm2786_vm14, %vm474_vm13  ;;  %v1083_v56 = vadd.f32 %v1082_v8, %v937_v12  ;;  %v1159_v25 = vadd.f32 %v2911_v60, %v1088_v18 }
 0x1f5   : > { %1784 = vmatmul.mubr.msk.f32.gmra.mxu1 %vm490_vm15, %v2072_v29  ;;  %v1717_v2 = vpop.f32.mrf.mxu0 }
 0x1f6   : > { %v1098_v50 = vadd.f32 %v1773_v9, %v1717_v2 }
 0x1f7   : > { %v790_v13 = vpop.permute.xlu1 %789  ;;  %v947_v34 = vpop.f32.mrf.mxu0 }
 0x1f8   : > { %vm810_vm5 = vcmp.eq.s32.totalorder %v2436_v23, %v790_v13  ;;  %v1156_v13 = vadd.f32 %v2911_v60, %v1073_v63 }
 0x1f9   : > { %vm826_vm6 = vmor %vm746_vm4, %vm810_vm5 }
 0x1fa   : > { %1728 = vmatmul.mubr.msk.f32.gmra.mxu0 %vm826_vm6, %v2072_v29  ;;  %vm731_vm6 = vcmp.eq.s32.totalorder %v2436_v23, %v713_v40  ;;  %v1161_v40 = vadd.f32 %v2911_v60, %v1098_v50  ;;  %1972 = vtanh.f32 %v1156_v13 }
 0x1fb   : > { %1974 = vtanh.f32 %v1159_v25 }
 0x1fc   : > { %v297_v26 = vpop.permute.xlu1 %296 }
 0x1fd   : > { %vm315_vm14 = vcmp.eq.s32.totalorder %v2436_v23, %v297_v26  ;;  %v1093_v26 = vadd.f32 %v1092_v49, %v947_v34 }
 0x1fe   : > { %vm331_vm8 = vmor %vm251_vm1, %vm315_vm14 }
 0x1ff   : > { %vm2817_vm9 = vmor %vm331_vm8, %vm395_vm7 }
 0x201   : > { %v569_v27 = vpop.permute.xlu1 %568 }
 0x202   : > { %vm587_vm13 = vcmp.eq.s32.totalorder %v2436_v23, %v569_v27 }
 0x203   : > { %vm667_vm4 = vmor %vm587_vm13, %vm651_vm0 }
 0x204   : > { %vm747_vm8 = vmor %vm667_vm4, %vm731_vm6  ;;  %vm1206_vm4 = vcmask 130048   ;;  %vm1313_vm6 = vcmask 1042434  }
 0x206   : > { %v236_v7 = vpop.permute.xlu1 %235 }
 0x207   : > { %vm252_vm12 = vcmp.eq.s32.totalorder %v2436_v23, %v236_v7 }
 0x20b   : > { %v300_v28 = vpop.permute.xlu1 %299 }
 0x20c   : > { %vm316_vm10 = vcmp.eq.s32.totalorder %v2436_v23, %v300_v28  ;;  %v1158_v28 = vadd.f32 %v2911_v60, %v1083_v56 }
 0x20d   : > { %vm332_vm15 = vmor %vm252_vm12, %vm316_vm10 }
 0x20e   : > { %1976 = vtanh.f32 %v1158_v28 }
 0x20f   : > { %1978 = vtanh.f32 %v1161_v40 }
 0x210   : > { %v572_v35 = vpop.permute.xlu1 %571 }
 0x211   : > { %vm588_vm10 = vcmp.eq.s32.totalorder %v2436_v23, %v572_v35 }
 0x213   : > { %v1776_v14 = vpop.f32.mrf.mxu1 }
 0x215   : > { %v636_v42 = vpop.permute.xlu1 %635  ;;  %v1102_v16 = vpop.f32.mrf.mxu1 }
 0x216   : > { %vm652_vm14 = vcmp.eq.s32.totalorder %v2436_v23, %v636_v42 }
 0x21a   : > { %v380_v32 = vpop.permute.xlu1 %379 }
 0x21b   : > { %vm396_vm11 = vcmp.eq.s32.totalorder %v2436_v23, %v380_v32  ;;  %v1720_v0 = vpop.f32.mrf.mxu0  ;;  %v1160_v32 = vadd.f32 %v2911_v60, %v1093_v26 }
 0x21c   : > { %vm412_vm2 = vmor %vm332_vm15, %vm396_vm11  ;;  %vm732_vm15 = vcmp.eq.s32.totalorder %v2436_v23, %v716_v45  ;;  %v1108_v27 = vadd.f32 %v1776_v14, %v1720_v0 }
 0x21d   : > { %vm492_vm7 = vmor %vm412_vm2, %vm476_vm3  ;;  %vm2074_vm3 = vmmov 0   ;;  %v957_v5 = vpop.f32.mrf.mxu0  ;;  %1980 = vtanh.f32 %v1160_v32 }
 0x21e   : > { %vm668_vm11 = vmor %vm588_vm10, %vm652_vm14  ;;  %v1103_v35 = vadd.f32 %v1102_v16, %v957_v5  ;;  %vm1317_vm14 = vcmask 1044484   ;;  %vm1323_vm10 = vcmask 1047559  }
 0x21f   : > { %v457_v39 = vpop.permute.xlu1 %456 }
 0x220   : > { %vm475_vm5 = vcmp.eq.s32.totalorder %v2436_v23, %v457_v39  ;;  %v1163_v39 = vadd.f32 %v2911_v60, %v1108_v27  ;;  %v1162_v33 = vadd.f32 %v2911_v60, %v1103_v35 }
 0x221   : > { %vm491_vm1 = vmor %vm2817_vm9, %vm475_vm5  ;;  %vm1311_vm5 = vcmask 1041409  }
 0x222   : > { %1786 = vmatprep.mubr.msk.f32.mxu1 %vm491_vm1, %v2072_v29  ;;  %vm748_vm9 = vmor %vm668_vm11, %vm732_vm15  ;;  %1982 = vtanh.f32 %v1163_v39  ;;  %vm1315_vm1 = vcmask 1043459  }
 0x223   : > { %1787 = vmatmul.mubr.msk.f32.gmra.mxu1 %vm492_vm7, %v2072_v29  ;;  %1984 = vtanh.f32 %v1162_v33  ;;  %vm1319_vm7 = vcmask 1045509  }
 0x224   : > { %v793_v3 = vpop.permute.xlu1 %792  ;;  %1828 = vmatprep.mubr.msk.f32.mxu1 %vm2074_vm3, %v2073_v20 }
 0x225   : > { %vm811_vm13 = vcmp.eq.s32.totalorder %v2436_v23, %v793_v3 }
 0x226   : > { %vm827_vm12 = vmor %vm747_vm8, %vm811_vm13  ;;  %vm1321_vm8 = vcmask 1046534  }
 0x227   : > { %1730 = vmatprep.mubr.msk.f32.mxu0 %vm827_vm12, %v2072_v29 }
 0x228   : > { %v796_v41 = vpop.permute.xlu1 %795 }
 0x229   : > { %vm812_vm0 = vcmp.eq.s32.totalorder %v2436_v23, %v796_v41  ;;  %v1297_v23 = vld [vmem:[%s3027_s2 + $0xa8] sm:$0xff] }
 0x22a   : > { %vm828_vm2 = vmor %vm748_vm9, %vm812_vm0  ;;  %1797 = vmatpush3.msra.mxu1 %v1297_v23 }
 0x22b   : > { %1731 = vmatmul.mubr.msk.f32.gmra.mxu0 %vm828_vm2, %v2072_v29  ;;  %v1296_v29 = vld [vmem:[%s3027_s2 + $0xa0] sm:$0xff]  ;;  %1798 = vmatprep.subr.mxu1 %v2073_v20 }
 0x22c   : > { %1793 = vmatprep.mubr.msk.f32.mxu0 %vm2074_vm3, %v2073_v20  ;;  %1799 = vmatpush3.msra.mxu1 %v1296_v29 }
 0x22d   : > { %1800 = vmatprep.subr.mxu1 %v2073_v20 }
 0x22e   : > { %1801 = vmatpush3.msra.mxu1 %v1295_v46 }
 0x22f   : > { %1802 = vmatprep.subr.mxu1 %v2073_v20 }
 0x230   : > { %1803 = vmatpush3.msra.mxu1 %v1294_v48 }
 0x231   : > { %1804 = vmatprep.subr.mxu1 %v2073_v20 }
 0x232   : > { %1805 = vmatpush3.msra.mxu1 %v1293_v4 }
 0x233   : > { %1806 = vmatprep.subr.mxu1 %v2073_v20 }
 0x234   : > { %1807 = vmatpush3.msra.mxu1 %v1292_v6 }
 0x235   : > { %1808 = vmatprep.subr.mxu1 %v2073_v20 }
 0x236   : > { %1809 = vmatpush3.msra.mxu1 %v1291_v38 }
 0x237   : > { %1810 = vmatprep.subr.mxu1 %v2073_v20 }
 0x238   : > { %1811 = vmatpush3.msra.mxu1 %v1290_v36 }
 0x239   : > { %1812 = vmatprep.subr.mxu1 %v2073_v20 }
 0x23a   : > { %1813 = vmatpush3.msra.mxu1 %v1289_v57  ;;  %v1971_v57 = vpop.eup %1970 }
 0x23b   : > { %1814 = vmatprep.subr.mxu1 %v2073_v20  ;;  %v1191_v30 = vadd.f32 %v1971_v57, %v2930_v61 }
 0x23c   : > { %1815 = vmatpush3.msra.mxu1 %v1288_v51  ;;  %v1973_v51 = vpop.eup %1972 }
 0x23d   : > { %1816 = vmatprep.subr.mxu1 %v2073_v20 }
 0x23e   : > { %1817 = vmatpush3.msra.mxu1 %v1287_v53  ;;  %v1975_v53 = vpop.eup %1974 }
 0x23f   : > { %1818 = vmatprep.subr.mxu1 %v2073_v20  ;;  %v1193_v49 = vadd.f32 %v1975_v53, %v2930_v61 }
 0x240   : > { %1819 = vmatpush3.msra.mxu1 %v1286_v54  ;;  %v1977_v54 = vpop.eup %1976 }
 0x241   : > { %1820 = vmatprep.subr.mxu1 %v2073_v20  ;;  %v1979_v55 = vpop.eup %1978  ;;  %v1217_v22 = vsel %vm1206_vm4, %v1193_v49, -inf }
 0x242   : > { %1821 = vmatpush3.msra.mxu1 %v1285_v58  ;;  %v1981_v58 = vpop.eup %1980  ;;  %v1195_v0 = vadd.f32 %v1979_v55, %v2930_v61 }
 0x243   : > { %1822 = vmatprep.subr.mxu1 %v2073_v20  ;;  %v1983_v47 = vpop.eup %1982 }
 0x244   : > { %1823 = vmatpush3.msra.mxu1 %v1284_v11  ;;  %v2935_v11 = vld [vmem:[%s3027_s2 + $0x8] sm:$0xff]  ;;  %v1985_v19 = vpop.eup %1984  ;;  %v1197_v18 = vadd.f32 %v1983_v47, %v2930_v61  ;;  %v1226_v50 = vsel %vm1206_vm4, %v1195_v0, -inf }
 0x245   : > { %1824 = vmatprep.subr.mxu1 %v2073_v20  ;;  %v1190_v12 = vadd.f32 %v1973_v51, %v2935_v11  ;;  %v1192_v8 = vadd.f32 %v1977_v54, %v2935_v11  ;;  %v1194_v9 = vadd.f32 %v1981_v58, %v2935_v11  ;;  %v1196_v16 = vadd.f32 %v1985_v19, %v2935_v11 }
 0x246   : > { %v1235_v32 = vsel %vm1206_vm4, %v1197_v18, -inf }
 0x247   : > { %v1225_v63 = vsel %vm1206_vm4, %v1194_v9, -inf  ;;  %v1234_v25 = vsel %vm1206_vm4, %v1196_v16, -inf }
 0x248   : > { %v1227_v40 = vmax.f32 %v1225_v63, %v1226_v50 }
 0x24d   : > { %v1779_v10 = vpop.f32.mrf.mxu1 }
 0x24f   : > { %v1112_v43 = vpop.f32.mrf.mxu1 }
 0x252   : > { %v1723_v1 = vpop.f32.mrf.mxu0 }
 0x253   : > { %v1118_v42 = vadd.f32 %v1779_v10, %v1723_v1  ;;  %v1208_v10 = vsel %vm1206_vm4, %v1191_v30, -inf }
 0x254   : > { %v967_v31 = vpop.f32.mrf.mxu0 }
 0x255   : > { %v1113_v52 = vadd.f32 %v1112_v43, %v967_v31  ;;  %v1165_v23 = vadd.f32 %v2911_v60, %v1118_v42  ;;  %v1207_v31 = vsel %vm1206_vm4, %v1190_v12, -inf  ;;  %v1216_v43 = vsel %vm1206_vm4, %v1192_v8, -inf }
 0x256   : > { %v1218_v35 = vmax.f32 %v1216_v43, %v1217_v22 }
 0x257   : > { %v1164_v46 = vadd.f32 %v2911_v60, %v1113_v52  ;;  %1986 = vtanh.f32 %v1165_v23 }
 0x259   : > { %1988 = vtanh.f32 %v1164_v46  ;;  %v1219_v46 = vrot.slane %v1218_v35, 4 }
 0x264   : > { %v1987_v17 = vpop.eup %1986 }
 0x266   : > { %v1989_v2 = vpop.eup %1988 }
 0x27b   : > { %v1782_v15 = vpop.f32.mrf.mxu1 }
 0x27d   : > { %v1122_v37 = vpop.f32.mrf.mxu1 }
 0x283   : > { %v1726_v59 = vpop.f32.mrf.mxu0 }
 0x284   : > { %v1128_v29 = vadd.f32 %v1782_v15, %v1726_v59  ;;  %v1198_v59 = vadd.f32 %v1989_v2, %v2935_v11 }
 0x285   : > { %v977_v21 = vpop.f32.mrf.mxu0 }
 0x286   : > { %v1123_v3 = vadd.f32 %v1122_v37, %v977_v21  ;;  %v1167_v38 = vadd.f32 %v2911_v60, %v1128_v29  ;;  %v1199_v37 = vadd.f32 %v1987_v17, %v2930_v61  ;;  %v1243_v42 = vsel %vm1206_vm4, %v1198_v59, -inf }
 0x288   : > { %v1166_v4 = vadd.f32 %v2911_v60, %v1123_v3  ;;  %v1209_v3 = vmax.f32 %v1207_v31, %v1208_v10  ;;  %v1244_v33 = vsel %vm1206_vm4, %v1199_v37, -inf }
 0x289   : > { %v1245_v23 = vmax.f32 %v1243_v42, %v1244_v33 }
 0x28a   : > { %1990 = vtanh.f32 %v1166_v4 }
 0x28b   : > { %v1246_v51 = vrot.slane %v1245_v23, 4 }
 0x28d   : > { %v1247_v19 = vmax.f32 %v1245_v23, %v1246_v51 }
 0x28f   : > { %v1248_v0 = vrot.slane %v1247_v19, 2 }
 0x291   : > { %v1249_v63 = vmax.f32 %v1247_v19, %v1248_v0 }
 0x297   : > { %v1991_v34 = vpop.eup %1990 }
 0x298   : > { %v1200_v21 = vadd.f32 %v1991_v34, %v2935_v11 }
 0x29a   : > { %v1252_v52 = vsel %vm1206_vm4, %v1200_v21, -inf }
 0x2b5   : > { %v1785_v7 = vpop.f32.mrf.mxu1 }
 0x2b7   : > { %v1132_v41 = vpop.f32.mrf.mxu1 }
 0x2ba   : > { %v1729_v24 = vpop.f32.mrf.mxu0 }
 0x2bb   : > { %v1138_v48 = vadd.f32 %v1785_v7, %v1729_v24 }
 0x2bc   : > { %v987_v45 = vpop.f32.mrf.mxu0 }
 0x2bd   : > { %v1133_v44 = vadd.f32 %v1132_v41, %v987_v45  ;;  %v1169_v36 = vadd.f32 %v2911_v60, %v1138_v48  ;;  %v1236_v41 = vmax.f32 %v1234_v25, %v1235_v32 }
 0x2bf   : > { %v1168_v6 = vadd.f32 %v2911_v60, %v1133_v44  ;;  %v1237_v57 = vrot.slane %v1236_v41, 4 }
 0x2c1   : > { %1992 = vtanh.f32 %v1168_v6  ;;  %v1228_v6 = vrot.slane %v1227_v40, 4  ;;  %v1238_v47 = vmax.f32 %v1236_v41, %v1237_v57 }
 0x2c2   : > { %1994 = vtanh.f32 %v1167_v38 }
 0x2c3   : > { %1996 = vtanh.f32 %v1169_v36  ;;  %v1210_v36 = vrot.slane %v1209_v3, 4  ;;  %v1229_v54 = vmax.f32 %v1227_v40, %v1228_v6  ;;  %v1239_v34 = vrot.slane %v1238_v47, 2  ;;  %v1282_v6 = vld [vmem:[%s3027_s2 + $0x30] sm:$0xff] }
 0x2c5   : > { %v1211_v58 = vmax.f32 %v1209_v3, %v1210_v36  ;;  %v1230_v12 = vrot.slane %v1229_v54, 2  ;;  %v1240_v59 = vmax.f32 %v1238_v47, %v1239_v34 }
 0x2c7   : > { %v1212_v9 = vrot.slane %v1211_v58, 2  ;;  %v1241_v37 = vrot.slane %v1240_v59, 1 }
 0x2c9   : > { %v1213_v43 = vmax.f32 %v1211_v58, %v1212_v9 }
 0x2cb   : > { %v1214_v50 = vrot.slane %v1213_v43, 1 }
 0x2ce   : > { %v1993_v5 = vpop.eup %1992 }
 0x2cf   : > { %v1995_v1 = vpop.eup %1994  ;;  %v1202_v24 = vadd.f32 %v1993_v5, %v2935_v11 }
 0x2d0   : > { %v1997_v15 = vpop.eup %1996  ;;  %v1201_v27 = vadd.f32 %v1995_v1, %v2930_v61  ;;  %v1231_v1 = vmax.f32 %v1229_v54, %v1230_v12 }
 0x2d1   : > { %v1203_v45 = vadd.f32 %v1997_v15, %v2930_v61  ;;  %v1261_v44 = vsel %vm1206_vm4, %v1202_v24, -inf }
 0x2d2   : > { %v1253_v29 = vsel %vm1206_vm4, %v1201_v27, -inf  ;;  %v1232_v22 = vrot.slane %v1231_v1, 1 }
 0x2d3   : > { %v1254_v48 = vmax.f32 %v1252_v52, %v1253_v29  ;;  %v1262_v4 = vsel %vm1206_vm4, %v1203_v45, -inf }
 0x2d4   : > { %v1263_v38 = vmax.f32 %v1261_v44, %v1262_v4  ;;  %v1233_v27 = vmax.f32 %v1231_v1, %v1232_v22  ;;  %v1283_v4 = vld [vmem:[%s3027_s2 + $0x38] sm:$0xff] }
 0x2d5   : > { %v1255_v53 = vrot.slane %v1254_v48, 4  ;;  %1825 = vmatpush3.msra.mxu1 %v1283_v4 }
 0x2d6   : > { %v1264_v55 = vrot.slane %v1263_v38, 4  ;;  %1826 = vmatprep.subr.mxu1 %v2073_v20 }
 0x2d7   : > { %v1256_v30 = vmax.f32 %v1254_v48, %v1255_v53  ;;  %1827 = vmatpush3.msra.mxu1 %v1282_v6  ;;  %v1588_v53 = vld [vmem:[%s3027_s2 + $0xb0] ss:$0 sm:$0xff] }
 0x2d8   : > { %v1265_v8 = vmax.f32 %v1263_v38, %v1264_v55  ;;  %v1586_v38 = vld [vmem:[%s3027_s2 + $0x28] ss:$0 sm:$0xff] }
 0x2d9   : > { %v1257_v16 = vrot.slane %v1256_v30, 2 }
 0x2da   : > { %v1266_v31 = vrot.slane %v1265_v8, 2 }
 0x2db   : > { %v1258_v21 = vmax.f32 %v1256_v30, %v1257_v16 }
 0x2dd   : > { %v1259_v25 = vrot.slane %v1258_v21, 1 }
 0x2df   : > { %v1260_v45 = vmax.f32 %v1258_v21, %v1259_v25 }
 0x2e3   : > { %v1788_v14 = vpop.f32.mrf.mxu1 }
 0x2e5   : > { %v1142_v13 = vpop.f32.mrf.mxu1 }
 0x2eb   : > { %v1732_v62 = vpop.f32.mrf.mxu0 }
 0x2ec   : > { %v1148_v56 = vadd.f32 %v1788_v14, %v1732_v62 }
 0x2ed   : > { %v997_v26 = vpop.f32.mrf.mxu0 }
 0x2ee   : > { %v1171_v7 = vadd.f32 %v2911_v60, %v1148_v56  ;;  %v1143_v28 = vadd.f32 %v1142_v13, %v997_v26  ;;  %v1250_v13 = vrot.slane %v1249_v63, 1 }
 0x2f0   : > { %1998 = vtanh.f32 %v1171_v7  ;;  %v1170_v39 = vadd.f32 %v2911_v60, %v1143_v28  ;;  %v1220_v60 = vmax.f32 %v1218_v35, %v1219_v46  ;;  %v1215_v28 = vmax.f32 %v1213_v43, %v1214_v50 }
 0x2f1   : > { %v1242_v35 = vmax.f32 %v1240_v59, %v1241_v37  ;;  %v1251_v42 = vmax.f32 %v1249_v63, %v1250_v13 }
 0x2f2   : > { %2000 = vtanh.f32 %v1170_v39  ;;  %v1221_v17 = vrot.slane %v1220_v60, 2 }
 0x2f4   : > { %v1222_v5 = vmax.f32 %v1220_v60, %v1221_v17 }
 0x2f6   : > { %v1223_v18 = vrot.slane %v1222_v5, 1 }
 0x2f8   : > { %v1224_v26 = vmax.f32 %v1222_v5, %v1223_v18 }
 0x2fa   : > { %v1312_v52 = vsel %vm1311_vm5, %v1224_v26, %v1215_v28 }
 0x2fb   : > { %v1314_v3 = vsel %vm1313_vm6, %v1233_v27, %v1312_v52 }
 0x2fc   : > { %v1316_v33 = vsel %vm1315_vm1, %v1242_v35, %v1314_v3 }
 0x2fd   : > { %v1999_v2 = vpop.eup %1998  ;;  %v1318_v44 = vsel %vm1317_vm14, %v1251_v42, %v1316_v33 }
 0x2fe   : > { %v1205_v49 = vadd.f32 %v1999_v2, %v2930_v61  ;;  %v1267_v61 = vmax.f32 %v1265_v8, %v1266_v31  ;;  %v1320_v29 = vsel %vm1319_vm7, %v1260_v45, %v1318_v44 }
 0x2ff   : > { %v2001_v14 = vpop.eup %2000 }
 0x300   : > { %v1204_v10 = vadd.f32 %v2001_v14, %v2935_v11  ;;  %v1271_v62 = vsel %vm1206_vm4, %v1205_v49, -inf  ;;  %v1268_v7 = vrot.slane %v1267_v61, 1 }
 0x302   : > { %v1270_v15 = vsel %vm1206_vm4, %v1204_v10, -inf  ;;  %v1269_v39 = vmax.f32 %v1267_v61, %v1268_v7 }
 0x303   : > { %v1272_v56 = vmax.f32 %v1270_v15, %v1271_v62 }
 0x304   : > { %v1322_v46 = vsel %vm1321_vm8, %v1269_v39, %v1320_v29 }
 0x305   : > { %v1273_v24 = vrot.slane %v1272_v56, 4 }
 0x307   : > { %v1274_v11 = vmax.f32 %v1272_v56, %v1273_v24 }
 0x309   : > { %v1275_v40 = vrot.slane %v1274_v11, 2 }
 0x30b   : > { %v1276_v32 = vmax.f32 %v1274_v11, %v1275_v40 }
 0x30d   : > { %v1277_v41 = vrot.slane %v1276_v32, 1 }
 0x30f   : > { %v1278_v23 = vmax.f32 %v1276_v32, %v1277_v41 }
 0x311   : > { %v1324_v48 = vsel %vm1323_vm10, %v1278_v23, %v1322_v46 }
 0x312   : > { %1794 = vmatmul.mubr.msk.f32.vlgmr.msra.gmra.mxu0 %vm1206_vm4, %v1324_v48 }
 0x3d2   : > { %v1393_v36 = vpop.f32.mrf.mxu0 }
 0x3d3   : > { %v1394_v57 = vadd.f32 %v1586_v38, %v1393_v36 }
 0x3d4   : > { %v1795_v51 = vpop.f32.mrf.mxu0 }
 0x3d5   : > { %v1397_v60 = vmax.f32 %v1394_v57, 0.0 }
 0x3d7   : > { %1829 = vmatmul.mubr.f32.vlgmr.msra.gmra.mxu1 %v1397_v60 }
 0x497   : > { %v1468_v20 = vpop.f32.mrf.mxu1 }
 0x498   : > { %v1469_v54 = vadd.f32 %v1588_v53, %v1468_v20 }
 0x499   : > { %v1830_v55 = vpop.f32.mrf.mxu1 }
 0x49a   : > { %1472 = vst [vmem:[%s164_s10] sm:$0xff] %v1469_v54 }
 0x49b   : > { %2015 = shalt.err (!%p2012_p3)
}
 0x49c   : > { %s2016_s27 = scalar_lea.hbm %s2990_s20, 128  ;;  %s2020_s4 = scalar_lea.hbm %s3028_s3, 256 }
 0x49d   : > { %p2017_p4 = scmp.ne.s32.totalorder %s2990_s20, %s2016_s27  ;;  %p2021_p9 = scmp.lt.s32.totalorder %s2990_s20, %s3028_s3 }
 0x49e   : > { %p2022_p10 = scmp.lt.s32.totalorder %s2020_s4, %s2016_s27 }
 0x49f   : > { %p2018_p7 = pnand %p2017_p4, %p2134_p5 }
 0x4a0   : > { %p2023_p11 = por %p2022_p10, %p2021_p9 }
 0x4a1   : > { %p2019_p8 = pneg %p2018_p7 }
 0x4a3   : > { %p2024_p12 = pnand %p2023_p11, %p2019_p8 }
 0x4a5   : > { %2027 = shalt.err (!%p2024_p12)
}
 0x4a6   : > { %1831 = dma.vmem_to_hbm [thread:$0]  (%p2134_p5), %s1488_s11, 128, %s2990_s20, %s1474_s28  }
 0x4a7 PF: > { %p1837_p13 = scmp.ge.s32.totalorder %s2062_s15, 2  ;;  %s1499_s7 = sand.u32 1, %s2050_s12  }
 0x4a8   : > { %s1500_s8 = scalar_lea.sflag [#allocation3], %s1499_s7 }
 0x4a9   : > { %p1834_p0 = pnand %p1837_p13, %p2138_p6 }
 0x4ab   : > { %p1835_p1 = pneg %p1834_p0 }
 0x4ad   : > { %2045 = dma.done.wait (%p1835_p1), %s1500_s8, 128  }
 0x4ae   : > { %2047 = vsyncadd (%p1835_p1), %s1500_s8, 4294967168  ;;  %p13_p2 = scmp.ge.s32.totalorder %s2121_s18, 4   ;;  %s3043_s12 = smov %s2054_s13 }
 0x4af   : > { %s3044_s13 = smov %s2058_s14  ;;  %s3045_s14 = smov %s2132_s21 }
 0x4b0   : > { %s3046_s15 = smov %s2121_s18  ;;  %15 = sbr.rel (!%p13_p2) target bundleno = 3 (0x3), region = 67 }
 0x4b5   :  { %1505 = vsyncpa [#allocation3], 1 }
 0x4b6   :  { %1507 = vsyncpa [#allocation3 + $0x1], 1 }

</bundles_post_ra>
